<compile_context>
chip_gen: v5e
topology: v5e:2x2
jax: 0.10.0
libtpu: 0.0.40
codegen_flags: <defaults>
</compile_context>

<pallas_src>
import numpy as np
import jax
import jax.numpy as jnp
from jax.experimental import pallas as pl
from jax.experimental.pallas import tpu as pltpu

# Full-precision f32 matmuls everywhere (reference, param-prep and kernel) so the
# f32 kernel path is reference-exact.
jax.config.update("jax_default_matmul_precision", "highest")

_SUBLANE = 8
_LANE = 128


def _round_up(x, m):
    return ((x + m - 1) // m) * m


def _lstm01_kernel(ids_ref, xwtab_ref, bias_ref, whh_ref, wlab_ref, blab_ref,
                   out_ref, xw_ref):
    """One batch-block of the whole LSTM forward (embedding + input-proj fused).

    ids_ref   : (S*bb, 1)  int32 token ids, seq-major within the block
    xwtab_ref : (Vp, 4H)   fused table: embedding @ W_ih^T (vocab rows zero-padded)
    bias_ref  : (1, 4H)    b_ih + b_hh, float32
    whh_ref   : (H, 4H)    recurrent weights
    wlab_ref  : (H, Op)    label weights, zero-padded lane-dense
    blab_ref  : (1, Op)    label bias, zero-padded
    out_ref   : (bb, Op)   sigmoid(final_h @ W_lab^T + b_lab)
    xw_ref    : (S*bb, 4H) f32 scratch — staged input projections
    """
    bb = out_ref.shape[0]
    S = ids_ref.shape[0] // bb
    H = whh_ref.shape[0]
    Vp = xwtab_ref.shape[0]
    mm_dtype = whh_ref.dtype

    # ---- Prologue: fused embedding gather + input projection as ONE MXU matmul.
    # one_hot(ids) @ (emb @ W_ih^T)  ==  emb[ids] @ W_ih^T  (exact in f32).
    ids = ids_ref[...]                                               # (S*bb, 1)
    vocab_iota = jax.lax.broadcasted_iota(jnp.int32, (S * bb, Vp), 1)
    onehot = (vocab_iota == ids).astype(mm_dtype)                    # (S*bb, Vp)
    xw_ref[...] = (jnp.dot(onehot, xwtab_ref[...],
                           preferred_element_type=jnp.float32)
                   + bias_ref[...])                                  # (S*bb, 4H) f32

    whh = whh_ref[...]

    def cell(gates, c):
        # Full-vreg nonlinearities (EUP slot has slack); gate blocks are plain
        # slices of the two results.  PyTorch gate order [i, f, g, o].
        sig = jax.nn.sigmoid(gates)
        tnh = jnp.tanh(gates)
        c_new = sig[:, H:2 * H] * c + sig[:, 0:H] * tnh[:, 2 * H:3 * H]
        h_new = sig[:, 3 * H:4 * H] * jnp.tanh(c_new)
        return h_new, c_new

    # ---- Recurrence (serial critical path).  t = 0: h == 0, skip the matmul.
    h, c = cell(xw_ref[0:bb, :], jnp.zeros((bb, H), jnp.float32))
    h_mm = h.astype(mm_dtype)
    # TODO(synk): keep W_hh weight-stationary on the MXU via pltpu.matmul_push_rhs /
    # matmul_acc_lhs / matmul_pop to avoid per-step RHS re-push.
    # TODO(synk): for very long S, switch this unrolled loop to
    # lax.fori_loop(..., unroll=True) over the xw_ref scratch.
    for t in range(1, S):
        gates = xw_ref[t * bb:(t + 1) * bb, :] + jnp.dot(
            h_mm, whh, preferred_element_type=jnp.float32)
        h, c = cell(gates, c)
        h_mm = h.astype(mm_dtype)   # cast at the update site (no-op in f32 mode)

    # ---- Final Linear + Sigmoid on the last hidden state (lane-dense store). ----
    logits = (jnp.dot(h, wlab_ref[...], preferred_element_type=jnp.float32)
              + blab_ref[...])
    out_ref[...] = jax.nn.sigmoid(logits).astype(out_ref.dtype)


def prepare_params(params, *, compute_dtype=jnp.float32):
    """One-time weight prep, hoisted out of the per-call forward.

    Fuses embedding @ W_ih^T into a single (Vp, 4H) table, folds biases, pads the
    label head to a lane-dense width, and casts the MXU matmul inputs to
    compute_dtype (bf16 is native MXU rate on v5e/v6e/v7x; gate/state math stays f32).
    """
    emb = params["embedding"].astype(jnp.float32)         # (V, E)
    wih_t = params["wih_t"].astype(jnp.float32)           # (E, 4H)
    whh_t = params["whh_t"]                               # (H, 4H)
    bias = params["bias"].astype(jnp.float32)             # (1, 4H) = b_ih + b_hh
    wlab_t = params["wlab_t"].astype(jnp.float32)         # (H, O)
    blab = params["blab"].astype(jnp.float32)             # (1, O)

    V = emb.shape[0]
    H = whh_t.shape[0]
    O = wlab_t.shape[1]
    Vp = _round_up(max(V, _LANE), _LANE)
    Op = _round_up(max(O, _LANE), _LANE)

    # TODO(synk): for large vocabularies, replace the one-hot MXU gather with a
    # per-row DMA / dynamic gather of this table instead of padding it to Vp rows.
    xw_tab = jnp.zeros((Vp, 4 * H), jnp.float32).at[:V, :].set(jnp.dot(emb, wih_t))
    wlab_p = jnp.zeros((H, Op), jnp.float32).at[:, :O].set(wlab_t)
    blab_p = jnp.zeros((1, Op), jnp.float32).at[:, :O].set(blab)

    return {
        "xw_tab": xw_tab.astype(compute_dtype),
        "bias": bias,
        "whh": whh_t.astype(compute_dtype),
        "wlab": wlab_p,
        "blab": blab_p,
    }


def lstm01_forward(token_ids, prepped, *, output_size, batch_block=None):
    """token_ids: (batch, seq) int -> (batch, output_size) float32 probabilities."""
    xw_tab = prepped["xw_tab"]
    bias = prepped["bias"]
    whh = prepped["whh"]
    wlab = prepped["wlab"]
    blab = prepped["blab"]

    B, S = token_ids.shape
    H = whh.shape[0]
    Vp = xw_tab.shape[0]
    Op = wlab.shape[1]

    Bp = _round_up(max(B, _SUBLANE), _SUBLANE)
    # Batch-block grid axis: on v7x pick batch_block = Bp // 2 (for real batches) so
    # the "parallel" axis splits across both TensorCores; v5e/v6e use one block.
    bb = Bp if batch_block is None else min(_round_up(batch_block, _SUBLANE), Bp)
    assert Bp % bb == 0, "batch_block must divide the padded batch"
    nblk = Bp // bb

    # Pad the batch and order ids as [block, t, b]: each grid step sees one
    # contiguous (S*bb, 1) slab.  (Tiny int32 reshuffle; the embedding gather
    # itself runs inside the kernel.)
    ids = jnp.zeros((Bp, S), jnp.int32).at[:B, :].set(token_ids.astype(jnp.int32))
    ids = ids.reshape(nblk, bb, S).transpose(0, 2, 1).reshape(nblk * S * bb, 1)

    wbytes = xw_tab.dtype.itemsize
    cost = pl.CostEstimate(
        flops=2 * S * Bp * Vp * 4 * H + 2 * S * Bp * H * 4 * H + 2 * Bp * H * Op,
        transcendentals=S * Bp * 9 * H + Bp * Op,
        bytes_accessed=(nblk * S * bb * 4
                        + (Vp * 4 * H + H * 4 * H) * wbytes
                        + (4 * H + H * Op + Op + Bp * Op) * 4),
    )

    grid_spec = pltpu.PrefetchScalarGridSpec(
        num_scalar_prefetch=0,
        grid=(nblk,),
        in_specs=[
            pl.BlockSpec((S * bb, 1), lambda g: (g, 0)),      # token ids (per block)
            pl.BlockSpec((Vp, 4 * H), lambda g: (0, 0)),      # fused emb @ W_ih^T table
            pl.BlockSpec((1, 4 * H), lambda g: (0, 0)),       # bias
            pl.BlockSpec((H, 4 * H), lambda g: (0, 0)),       # W_hh^T (resident)
            pl.BlockSpec((H, Op), lambda g: (0, 0)),          # W_label^T (lane-padded)
            pl.BlockSpec((1, Op), lambda g: (0, 0)),          # b_label
        ],
        out_specs=pl.BlockSpec((bb, Op), lambda g: (g, 0)),
        scratch_shapes=[pltpu.VMEM((S * bb, 4 * H), jnp.float32)],
    )

    out = pl.pallas_call(
        _lstm01_kernel,
        out_shape=jax.ShapeDtypeStruct((Bp, Op), jnp.float32),
        grid_spec=grid_spec,
        compiler_params=pltpu.CompilerParams(
            dimension_semantics=("parallel",)),
        cost_estimate=cost,
    )(ids, xw_tab, bias, whh, wlab, blab)

    return out[:B, :output_size]


def _reference_forward(token_ids, params):
    """Pure-JAX reference of the same math (sanity check)."""
    emb = jnp.take(params["embedding"].astype(jnp.float32), token_ids, axis=0)  # (B,S,E)
    x = jnp.transpose(emb, (1, 0, 2))                                           # (S,B,E)
    H = params["whh_t"].shape[0]
    B = x.shape[1]

    def step(carry, x_t):
        h, c = carry
        gates = x_t @ params["wih_t"] + h @ params["whh_t"] + params["bias"]
        i = jax.nn.sigmoid(gates[:, 0 * H:1 * H])
        f = jax.nn.sigmoid(gates[:, 1 * H:2 * H])
        g = jnp.tanh(gates[:, 2 * H:3 * H])
        o = jax.nn.sigmoid(gates[:, 3 * H:4 * H])
        c = f * c + i * g
        h = o * jnp.tanh(c)
        return (h, c), None

    h0 = jnp.zeros((B, H), jnp.float32)
    c0 = jnp.zeros((B, H), jnp.float32)
    (h, _), _ = jax.lax.scan(step, (h0, c0), x)
    return jax.nn.sigmoid(h @ params["wlab_t"] + params["blab"])


def make_params(key, vocab_size, embedding_length, hidden_size, output_size):
    ks = jax.random.split(key, 7)
    s = 1.0 / np.sqrt(hidden_size)
    return {
        "embedding": jax.random.normal(ks[0], (vocab_size, embedding_length), jnp.float32),
        # PyTorch stores W_ih (4H, E) / W_hh (4H, H); we keep transposed copies.
        "wih_t": jax.random.uniform(ks[1], (embedding_length, 4 * hidden_size),
                                    jnp.float32, -s, s),
        "whh_t": jax.random.uniform(ks[2], (hidden_size, 4 * hidden_size),
                                    jnp.float32, -s, s),
        # bias = b_ih + b_hh folded into one (1, 4H) row.
        "bias": (jax.random.uniform(ks[3], (1, 4 * hidden_size), jnp.float32, -s, s)
                 + jax.random.uniform(ks[4], (1, 4 * hidden_size), jnp.float32, -s, s)),
        "wlab_t": jax.random.uniform(ks[5], (hidden_size, output_size),
                                     jnp.float32, -s, s),
        "blab": jax.random.uniform(ks[6], (1, output_size), jnp.float32, -s, s),
    }


if __name__ == "__main__":
    batch_size = 2
    seq_len = 8
    hidden_size = 32
    embedding_length = 16
    vocab_size = 50
    output_size = 2

    key = jax.random.PRNGKey(0)
    k_tok, k_par = jax.random.split(key)
    params = make_params(k_par, vocab_size, embedding_length, hidden_size, output_size)
    token_ids = jax.random.randint(k_tok, (batch_size, seq_len), 0, vocab_size, jnp.int32)

    ref = jax.block_until_ready(_reference_forward(token_ids, params))

    fwd = jax.jit(lstm01_forward, static_argnames=("output_size", "batch_block"))

    # f32 path (reference-exact module semantics).
    prepped_f32 = prepare_params(params, compute_dtype=jnp.float32)
    out = jax.block_until_ready(fwd(token_ids, prepped_f32, output_size=output_size))
    assert out.shape == (batch_size, output_size)
    assert np.allclose(np.asarray(out), np.asarray(ref), atol=2e-5, rtol=2e-5)

    # bf16 MXU-input path (native MXU rate on v5e/v6e/v7x); gate/state math stays f32.
    prepped_bf16 = prepare_params(params, compute_dtype=jnp.bfloat16)
    out_bf16 = jax.block_until_ready(fwd(token_ids, prepped_bf16, output_size=output_size))
    assert np.allclose(np.asarray(out_bf16), np.asarray(ref), atol=2e-2, rtol=2e-2)

    print("KERNEL_OK")
</pallas_src>

<mosaic_0001>
module attributes {stable_mosaic.version = 11 : i64} {
  func.func @_lstm01_kernel(%arg0: i32, %arg1: memref<64x1xi32, #tpu.memory_space<vmem>>, %arg2: memref<128x128xf32, #tpu.memory_space<vmem>>, %arg3: memref<1x128xf32, #tpu.memory_space<vmem>>, %arg4: memref<32x128xf32, #tpu.memory_space<vmem>>, %arg5: memref<32x128xf32, #tpu.memory_space<vmem>>, %arg6: memref<1x128xf32, #tpu.memory_space<vmem>>, %arg7: memref<8x128xf32, #tpu.memory_space<vmem>>, %arg8: memref<64x128xf32, #tpu.memory_space<vmem>>) attributes {dimension_semantics = [#tpu.dimension_semantics<parallel>], iteration_bounds = array<i64: 1>, scalar_prefetch = 0 : i64, scratch_operands = 1 : i64, tpu.core_type = #tpu.core_type<tc>, window_params = [{transform_indices = @transform_0, window_bounds = array<i64: 64, 1>}, {pipeline_mode = #tpu.pipeline_mode<synchronous>, transform_indices = @transform_1, window_bounds = array<i64: 128, 128>}, {pipeline_mode = #tpu.pipeline_mode<synchronous>, transform_indices = @transform_2, window_bounds = array<i64: 1, 128>}, {pipeline_mode = #tpu.pipeline_mode<synchronous>, transform_indices = @transform_3, window_bounds = array<i64: 32, 128>}, {pipeline_mode = #tpu.pipeline_mode<synchronous>, transform_indices = @transform_4, window_bounds = array<i64: 32, 128>}, {pipeline_mode = #tpu.pipeline_mode<synchronous>, transform_indices = @transform_5, window_bounds = array<i64: 1, 128>}, {transform_indices = @transform_6, window_bounds = array<i64: 8, 128>}]} {
    %c0 = arith.constant 0 : index
    %c0_0 = arith.constant 0 : index
    %0 = vector.load %arg1[%c0, %c0_0] : memref<64x1xi32, #tpu.memory_space<vmem>>, vector<64x1xi32>
    %1 = tpu.iota {dimensions = array<i32: 1>} : vector<64x128xi32>
    %2 = vector.broadcast %0 : vector<64x1xi32> to vector<64x128xi32>
    %3 = arith.cmpi eq, %1, %2 : vector<64x128xi32>
    %4 = arith.extui %3 : vector<64x128xi1> to vector<64x128xi32>
    %5 = arith.sitofp %4 : vector<64x128xi32> to vector<64x128xf32>
    %c0_1 = arith.constant 0 : index
    %c0_2 = arith.constant 0 : index
    %6 = vector.load %arg2[%c0_1, %c0_2] : memref<128x128xf32, #tpu.memory_space<vmem>>, vector<128x128xf32>
    %cst = arith.constant dense<0.000000e+00> : vector<64x128xf32>
    %7 = tpu.matmul %5, %6, %cst {dimension_numbers = #tpu.dot_dimension_numbers<[1], [0], [0], [1], [0, 0, 1, 1], [], []>, precision = #tpu.contract_precision<fp32>} : vector<64x128xf32>, vector<128x128xf32>, vector<64x128xf32> -> vector<64x128xf32>
    %c0_3 = arith.constant 0 : index
    %c0_4 = arith.constant 0 : index
    %8 = vector.load %arg3[%c0_3, %c0_4] : memref<1x128xf32, #tpu.memory_space<vmem>>, vector<1x128xf32>
    %9 = vector.broadcast %8 : vector<1x128xf32> to vector<64x128xf32>
    %10 = arith.addf %7, %9 : vector<64x128xf32>
    %c0_5 = arith.constant 0 : index
    %c0_6 = arith.constant 0 : index
    %11 = vector.load %arg8[%c0_5, %c0_6] : memref<64x128xf32, #tpu.memory_space<vmem>>, vector<64x128xf32>
    tpu.vector_store %arg8[%c0_5, %c0_6], %10 {strides = array<i32>} : memref<64x128xf32, #tpu.memory_space<vmem>>, vector<64x128xf32>,
    %c0_7 = arith.constant 0 : index
    %c0_8 = arith.constant 0 : index
    %12 = vector.load %arg4[%c0_7, %c0_8] : memref<32x128xf32, #tpu.memory_space<vmem>>, vector<32x128xf32>
    %c0_9 = arith.constant 0 : index
    %c0_10 = arith.constant 0 : index
    %13 = vector.load %arg8[%c0_9, %c0_10] : memref<64x128xf32, #tpu.memory_space<vmem>>, vector<8x128xf32>
    %cst_11 = arith.constant 0.000000e+00 : f32
    %14 = vector.broadcast %cst_11 : f32 to vector<8x32xf32>
    %15 = arith.negf %13 : vector<8x128xf32>
    %16 = math.exp %15 : vector<8x128xf32>
    %cst_12 = arith.constant 1.000000e+00 : f32
    %17 = vector.broadcast %cst_12 : f32 to vector<8x128xf32>
    %18 = arith.addf %17, %16 : vector<8x128xf32>
    %19 = arith.divf %17, %18 : vector<8x128xf32>
    %20 = math.tanh %13 : vector<8x128xf32>
    %21 = vector.extract_strided_slice %19 {offsets = [0, 32], sizes = [8, 32], strides = [1, 1]} : vector<8x128xf32> to vector<8x32xf32>
    %22 = arith.mulf %21, %14 : vector<8x32xf32>
    %23 = vector.extract_strided_slice %19 {offsets = [0, 0], sizes = [8, 32], strides = [1, 1]} : vector<8x128xf32> to vector<8x32xf32>
    %24 = vector.extract_strided_slice %20 {offsets = [0, 64], sizes = [8, 32], strides = [1, 1]} : vector<8x128xf32> to vector<8x32xf32>
    %25 = arith.mulf %23, %24 : vector<8x32xf32>
    %26 = arith.addf %22, %25 : vector<8x32xf32>
    %27 = vector.extract_strided_slice %19 {offsets = [0, 96], sizes = [8, 32], strides = [1, 1]} : vector<8x128xf32> to vector<8x32xf32>
    %28 = math.tanh %26 : vector<8x32xf32>
    %29 = arith.mulf %27, %28 : vector<8x32xf32>
    %c8 = arith.constant 8 : index
    %c0_13 = arith.constant 0 : index
    %30 = vector.load %arg8[%c8, %c0_13] : memref<64x128xf32, #tpu.memory_space<vmem>>, vector<8x128xf32>
    %cst_14 = arith.constant dense<0.000000e+00> : vector<8x128xf32>
    %31 = tpu.matmul %29, %12, %cst_14 {dimension_numbers = #tpu.dot_dimension_numbers<[1], [0], [0], [1], [0, 0, 1, 1], [], []>, precision = #tpu.contract_precision<fp32>} : vector<8x32xf32>, vector<32x128xf32>, vector<8x128xf32> -> vector<8x128xf32>
    %32 = arith.addf %30, %31 : vector<8x128xf32>
    %33 = arith.negf %32 : vector<8x128xf32>
    %34 = math.exp %33 : vector<8x128xf32>
    %cst_15 = arith.constant 1.000000e+00 : f32
    %35 = vector.broadcast %cst_15 : f32 to vector<8x128xf32>
    %36 = arith.addf %35, %34 : vector<8x128xf32>
    %37 = arith.divf %35, %36 : vector<8x128xf32>
    %38 = math.tanh %32 : vector<8x128xf32>
    %39 = vector.extract_strided_slice %37 {offsets = [0, 32], sizes = [8, 32], strides = [1, 1]} : vector<8x128xf32> to vector<8x32xf32>
    %40 = arith.mulf %39, %26 : vector<8x32xf32>
    %41 = vector.extract_strided_slice %37 {offsets = [0, 0], sizes = [8, 32], strides = [1, 1]} : vector<8x128xf32> to vector<8x32xf32>
    %42 = vector.extract_strided_slice %38 {offsets = [0, 64], sizes = [8, 32], strides = [1, 1]} : vector<8x128xf32> to vector<8x32xf32>
    %43 = arith.mulf %41, %42 : vector<8x32xf32>
    %44 = arith.addf %40, %43 : vector<8x32xf32>
    %45 = vector.extract_strided_slice %37 {offsets = [0, 96], sizes = [8, 32], strides = [1, 1]} : vector<8x128xf32> to vector<8x32xf32>
    %46 = math.tanh %44 : vector<8x32xf32>
    %47 = arith.mulf %45, %46 : vector<8x32xf32>
    %c16 = arith.constant 16 : index
    %c0_16 = arith.constant 0 : index
    %48 = vector.load %arg8[%c16, %c0_16] : memref<64x128xf32, #tpu.memory_space<vmem>>, vector<8x128xf32>
    %cst_17 = arith.constant dense<0.000000e+00> : vector<8x128xf32>
    %49 = tpu.matmul %47, %12, %cst_17 {dimension_numbers = #tpu.dot_dimension_numbers<[1], [0], [0], [1], [0, 0, 1, 1], [], []>, precision = #tpu.contract_precision<fp32>} : vector<8x32xf32>, vector<32x128xf32>, vector<8x128xf32> -> vector<8x128xf32>
    %50 = arith.addf %48, %49 : vector<8x128xf32>
    %51 = arith.negf %50 : vector<8x128xf32>
    %52 = math.exp %51 : vector<8x128xf32>
    %cst_18 = arith.constant 1.000000e+00 : f32
    %53 = vector.broadcast %cst_18 : f32 to vector<8x128xf32>
    %54 = arith.addf %53, %52 : vector<8x128xf32>
    %55 = arith.divf %53, %54 : vector<8x128xf32>
    %56 = math.tanh %50 : vector<8x128xf32>
    %57 = vector.extract_strided_slice %55 {offsets = [0, 32], sizes = [8, 32], strides = [1, 1]} : vector<8x128xf32> to vector<8x32xf32>
    %58 = arith.mulf %57, %44 : vector<8x32xf32>
    %59 = vector.extract_strided_slice %55 {offsets = [0, 0], sizes = [8, 32], strides = [1, 1]} : vector<8x128xf32> to vector<8x32xf32>
    %60 = vector.extract_strided_slice %56 {offsets = [0, 64], sizes = [8, 32], strides = [1, 1]} : vector<8x128xf32> to vector<8x32xf32>
    %61 = arith.mulf %59, %60 : vector<8x32xf32>
    %62 = arith.addf %58, %61 : vector<8x32xf32>
    %63 = vector.extract_strided_slice %55 {offsets = [0, 96], sizes = [8, 32], strides = [1, 1]} : vector<8x128xf32> to vector<8x32xf32>
    %64 = math.tanh %62 : vector<8x32xf32>
    %65 = arith.mulf %63, %64 : vector<8x32xf32>
    %c24 = arith.constant 24 : index
    %c0_19 = arith.constant 0 : index
    %66 = vector.load %arg8[%c24, %c0_19] : memref<64x128xf32, #tpu.memory_space<vmem>>, vector<8x128xf32>
    %cst_20 = arith.constant dense<0.000000e+00> : vector<8x128xf32>
    %67 = tpu.matmul %65, %12, %cst_20 {dimension_numbers = #tpu.dot_dimension_numbers<[1], [0], [0], [1], [0, 0, 1, 1], [], []>, precision = #tpu.contract_precision<fp32>} : vector<8x32xf32>, vector<32x128xf32>, vector<8x128xf32> -> vector<8x128xf32>
    %68 = arith.addf %66, %67 : vector<8x128xf32>
    %69 = arith.negf %68 : vector<8x128xf32>
    %70 = math.exp %69 : vector<8x128xf32>
    %cst_21 = arith.constant 1.000000e+00 : f32
    %71 = vector.broadcast %cst_21 : f32 to vector<8x128xf32>
    %72 = arith.addf %71, %70 : vector<8x128xf32>
    %73 = arith.divf %71, %72 : vector<8x128xf32>
    %74 = math.tanh %68 : vector<8x128xf32>
    %75 = vector.extract_strided_slice %73 {offsets = [0, 32], sizes = [8, 32], strides = [1, 1]} : vector<8x128xf32> to vector<8x32xf32>
    %76 = arith.mulf %75, %62 : vector<8x32xf32>
    %77 = vector.extract_strided_slice %73 {offsets = [0, 0], sizes = [8, 32], strides = [1, 1]} : vector<8x128xf32> to vector<8x32xf32>
    %78 = vector.extract_strided_slice %74 {offsets = [0, 64], sizes = [8, 32], strides = [1, 1]} : vector<8x128xf32> to vector<8x32xf32>
    %79 = arith.mulf %77, %78 : vector<8x32xf32>
    %80 = arith.addf %76, %79 : vector<8x32xf32>
    %81 = vector.extract_strided_slice %73 {offsets = [0, 96], sizes = [8, 32], strides = [1, 1]} : vector<8x128xf32> to vector<8x32xf32>
    %82 = math.tanh %80 : vector<8x32xf32>
    %83 = arith.mulf %81, %82 : vector<8x32xf32>
    %c32 = arith.constant 32 : index
    %c0_22 = arith.constant 0 : index
    %84 = vector.load %arg8[%c32, %c0_22] : memref<64x128xf32, #tpu.memory_space<vmem>>, vector<8x128xf32>
    %cst_23 = arith.constant dense<0.000000e+00> : vector<8x128xf32>
    %85 = tpu.matmul %83, %12, %cst_23 {dimension_numbers = #tpu.dot_dimension_numbers<[1], [0], [0], [1], [0, 0, 1, 1], [], []>, precision = #tpu.contract_precision<fp32>} : vector<8x32xf32>, vector<32x128xf32>, vector<8x128xf32> -> vector<8x128xf32>
    %86 = arith.addf %84, %85 : vector<8x128xf32>
    %87 = arith.negf %86 : vector<8x128xf32>
    %88 = math.exp %87 : vector<8x128xf32>
    %cst_24 = arith.constant 1.000000e+00 : f32
    %89 = vector.broadcast %cst_24 : f32 to vector<8x128xf32>
    %90 = arith.addf %89, %88 : vector<8x128xf32>
    %91 = arith.divf %89, %90 : vector<8x128xf32>
    %92 = math.tanh %86 : vector<8x128xf32>
    %93 = vector.extract_strided_slice %91 {offsets = [0, 32], sizes = [8, 32], strides = [1, 1]} : vector<8x128xf32> to vector<8x32xf32>
    %94 = arith.mulf %93, %80 : vector<8x32xf32>
    %95 = vector.extract_strided_slice %91 {offsets = [0, 0], sizes = [8, 32], strides = [1, 1]} : vector<8x128xf32> to vector<8x32xf32>
    %96 = vector.extract_strided_slice %92 {offsets = [0, 64], sizes = [8, 32], strides = [1, 1]} : vector<8x128xf32> to vector<8x32xf32>
    %97 = arith.mulf %95, %96 : vector<8x32xf32>
    %98 = arith.addf %94, %97 : vector<8x32xf32>
    %99 = vector.extract_strided_slice %91 {offsets = [0, 96], sizes = [8, 32], strides = [1, 1]} : vector<8x128xf32> to vector<8x32xf32>
    %100 = math.tanh %98 : vector<8x32xf32>
    %101 = arith.mulf %99, %100 : vector<8x32xf32>
    %c40 = arith.constant 40 : index
    %c0_25 = arith.constant 0 : index
    %102 = vector.load %arg8[%c40, %c0_25] : memref<64x128xf32, #tpu.memory_space<vmem>>, vector<8x128xf32>
    %cst_26 = arith.constant dense<0.000000e+00> : vector<8x128xf32>
    %103 = tpu.matmul %101, %12, %cst_26 {dimension_numbers = #tpu.dot_dimension_numbers<[1], [0], [0], [1], [0, 0, 1, 1], [], []>, precision = #tpu.contract_precision<fp32>} : vector<8x32xf32>, vector<32x128xf32>, vector<8x128xf32> -> vector<8x128xf32>
    %104 = arith.addf %102, %103 : vector<8x128xf32>
    %105 = arith.negf %104 : vector<8x128xf32>
    %106 = math.exp %105 : vector<8x128xf32>
    %cst_27 = arith.constant 1.000000e+00 : f32
    %107 = vector.broadcast %cst_27 : f32 to vector<8x128xf32>
    %108 = arith.addf %107, %106 : vector<8x128xf32>
    %109 = arith.divf %107, %108 : vector<8x128xf32>
    %110 = math.tanh %104 : vector<8x128xf32>
    %111 = vector.extract_strided_slice %109 {offsets = [0, 32], sizes = [8, 32], strides = [1, 1]} : vector<8x128xf32> to vector<8x32xf32>
    %112 = arith.mulf %111, %98 : vector<8x32xf32>
    %113 = vector.extract_strided_slice %109 {offsets = [0, 0], sizes = [8, 32], strides = [1, 1]} : vector<8x128xf32> to vector<8x32xf32>
    %114 = vector.extract_strided_slice %110 {offsets = [0, 64], sizes = [8, 32], strides = [1, 1]} : vector<8x128xf32> to vector<8x32xf32>
    %115 = arith.mulf %113, %114 : vector<8x32xf32>
    %116 = arith.addf %112, %115 : vector<8x32xf32>
    %117 = vector.extract_strided_slice %109 {offsets = [0, 96], sizes = [8, 32], strides = [1, 1]} : vector<8x128xf32> to vector<8x32xf32>
    %118 = math.tanh %116 : vector<8x32xf32>
    %119 = arith.mulf %117, %118 : vector<8x32xf32>
    %c48 = arith.constant 48 : index
    %c0_28 = arith.constant 0 : index
    %120 = vector.load %arg8[%c48, %c0_28] : memref<64x128xf32, #tpu.memory_space<vmem>>, vector<8x128xf32>
    %cst_29 = arith.constant dense<0.000000e+00> : vector<8x128xf32>
    %121 = tpu.matmul %119, %12, %cst_29 {dimension_numbers = #tpu.dot_dimension_numbers<[1], [0], [0], [1], [0, 0, 1, 1], [], []>, precision = #tpu.contract_precision<fp32>} : vector<8x32xf32>, vector<32x128xf32>, vector<8x128xf32> -> vector<8x128xf32>
    %122 = arith.addf %120, %121 : vector<8x128xf32>
    %123 = arith.negf %122 : vector<8x128xf32>
    %124 = math.exp %123 : vector<8x128xf32>
    %cst_30 = arith.constant 1.000000e+00 : f32
    %125 = vector.broadcast %cst_30 : f32 to vector<8x128xf32>
    %126 = arith.addf %125, %124 : vector<8x128xf32>
    %127 = arith.divf %125, %126 : vector<8x128xf32>
    %128 = math.tanh %122 : vector<8x128xf32>
    %129 = vector.extract_strided_slice %127 {offsets = [0, 32], sizes = [8, 32], strides = [1, 1]} : vector<8x128xf32> to vector<8x32xf32>
    %130 = arith.mulf %129, %116 : vector<8x32xf32>
    %131 = vector.extract_strided_slice %127 {offsets = [0, 0], sizes = [8, 32], strides = [1, 1]} : vector<8x128xf32> to vector<8x32xf32>
    %132 = vector.extract_strided_slice %128 {offsets = [0, 64], sizes = [8, 32], strides = [1, 1]} : vector<8x128xf32> to vector<8x32xf32>
    %133 = arith.mulf %131, %132 : vector<8x32xf32>
    %134 = arith.addf %130, %133 : vector<8x32xf32>
    %135 = vector.extract_strided_slice %127 {offsets = [0, 96], sizes = [8, 32], strides = [1, 1]} : vector<8x128xf32> to vector<8x32xf32>
    %136 = math.tanh %134 : vector<8x32xf32>
    %137 = arith.mulf %135, %136 : vector<8x32xf32>
    %c56 = arith.constant 56 : index
    %c0_31 = arith.constant 0 : index
    %138 = vector.load %arg8[%c56, %c0_31] : memref<64x128xf32, #tpu.memory_space<vmem>>, vector<8x128xf32>
    %cst_32 = arith.constant dense<0.000000e+00> : vector<8x128xf32>
    %139 = tpu.matmul %137, %12, %cst_32 {dimension_numbers = #tpu.dot_dimension_numbers<[1], [0], [0], [1], [0, 0, 1, 1], [], []>, precision = #tpu.contract_precision<fp32>} : vector<8x32xf32>, vector<32x128xf32>, vector<8x128xf32> -> vector<8x128xf32>
    %140 = arith.addf %138, %139 : vector<8x128xf32>
    %141 = arith.negf %140 : vector<8x128xf32>
    %142 = math.exp %141 : vector<8x128xf32>
    %cst_33 = arith.constant 1.000000e+00 : f32
    %143 = vector.broadcast %cst_33 : f32 to vector<8x128xf32>
    %144 = arith.addf %143, %142 : vector<8x128xf32>
    %145 = arith.divf %143, %144 : vector<8x128xf32>
    %146 = math.tanh %140 : vector<8x128xf32>
    %147 = vector.extract_strided_slice %145 {offsets = [0, 32], sizes = [8, 32], strides = [1, 1]} : vector<8x128xf32> to vector<8x32xf32>
    %148 = arith.mulf %147, %134 : vector<8x32xf32>
    %149 = vector.extract_strided_slice %145 {offsets = [0, 0], sizes = [8, 32], strides = [1, 1]} : vector<8x128xf32> to vector<8x32xf32>
    %150 = vector.extract_strided_slice %146 {offsets = [0, 64], sizes = [8, 32], strides = [1, 1]} : vector<8x128xf32> to vector<8x32xf32>
    %151 = arith.mulf %149, %150 : vector<8x32xf32>
    %152 = arith.addf %148, %151 : vector<8x32xf32>
    %153 = vector.extract_strided_slice %145 {offsets = [0, 96], sizes = [8, 32], strides = [1, 1]} : vector<8x128xf32> to vector<8x32xf32>
    %154 = math.tanh %152 : vector<8x32xf32>
    %155 = arith.mulf %153, %154 : vector<8x32xf32>
    %c0_34 = arith.constant 0 : index
    %c0_35 = arith.constant 0 : index
    %156 = vector.load %arg5[%c0_34, %c0_35] : memref<32x128xf32, #tpu.memory_space<vmem>>, vector<32x128xf32>
    %cst_36 = arith.constant dense<0.000000e+00> : vector<8x128xf32>
    %157 = tpu.matmul %155, %156, %cst_36 {dimension_numbers = #tpu.dot_dimension_numbers<[1], [0], [0], [1], [0, 0, 1, 1], [], []>, precision = #tpu.contract_precision<fp32>} : vector<8x32xf32>, vector<32x128xf32>, vector<8x128xf32> -> vector<8x128xf32>
    %c0_37 = arith.constant 0 : index
    %c0_38 = arith.constant 0 : index
    %158 = vector.load %arg6[%c0_37, %c0_38] : memref<1x128xf32, #tpu.memory_space<vmem>>, vector<1x128xf32>
    %159 = vector.broadcast %158 : vector<1x128xf32> to vector<8x128xf32>
    %160 = arith.addf %157, %159 : vector<8x128xf32>
    %161 = arith.negf %160 : vector<8x128xf32>
    %162 = math.exp %161 : vector<8x128xf32>
    %cst_39 = arith.constant 1.000000e+00 : f32
    %163 = vector.broadcast %cst_39 : f32 to vector<8x128xf32>
    %164 = arith.addf %163, %162 : vector<8x128xf32>
    %165 = arith.divf %163, %164 : vector<8x128xf32>
    %c0_40 = arith.constant 0 : index
    %c0_41 = arith.constant 0 : index
    %166 = vector.load %arg7[%c0_40, %c0_41] : memref<8x128xf32, #tpu.memory_space<vmem>>, vector<8x128xf32>
    tpu.vector_store %arg7[%c0_40, %c0_41], %165 {strides = array<i32>} : memref<8x128xf32, #tpu.memory_space<vmem>>, vector<8x128xf32>,
    return
  }
  func.func @transform_0(%arg0: i32) -> (i32, i32) {
    %c0_i32 = arith.constant 0 : i32
    %c0_i32_0 = arith.constant 0 : i32
    return %arg0, %c0_i32 : i32, i32
  }
  func.func @transform_1(%arg0: i32) -> (i32, i32) {
    %c0_i32 = arith.constant 0 : i32
    %c0_i32_0 = arith.constant 0 : i32
    %c0_i32_1 = arith.constant 0 : i32
    return %c0_i32, %c0_i32_0 : i32, i32
  }
  func.func @transform_2(%arg0: i32) -> (i32, i32) {
    %c0_i32 = arith.constant 0 : i32
    %c0_i32_0 = arith.constant 0 : i32
    %c0_i32_1 = arith.constant 0 : i32
    return %c0_i32, %c0_i32_0 : i32, i32
  }
  func.func @transform_3(%arg0: i32) -> (i32, i32) {
    %c0_i32 = arith.constant 0 : i32
    %c0_i32_0 = arith.constant 0 : i32
    %c0_i32_1 = arith.constant 0 : i32
    return %c0_i32, %c0_i32_0 : i32, i32
  }
  func.func @transform_4(%arg0: i32) -> (i32, i32) {
    %c0_i32 = arith.constant 0 : i32
    %c0_i32_0 = arith.constant 0 : i32
    %c0_i32_1 = arith.constant 0 : i32
    return %c0_i32, %c0_i32_0 : i32, i32
  }
  func.func @transform_5(%arg0: i32) -> (i32, i32) {
    %c0_i32 = arith.constant 0 : i32
    %c0_i32_0 = arith.constant 0 : i32
    %c0_i32_1 = arith.constant 0 : i32
    return %c0_i32, %c0_i32_0 : i32, i32
  }
  func.func @transform_6(%arg0: i32) -> (i32, i32) {
    %c0_i32 = arith.constant 0 : i32
    %c0_i32_0 = arith.constant 0 : i32
    return %arg0, %c0_i32 : i32, i32
  }
}

</mosaic_0001>

<bundles_post_ra>
// kernel: lstm01_forward.1
= control target key start
LH: loop header
LB: loop body
LE: loop exit
PB: predicated region body
PF: predicated region fallthrough
CT: control target
= control target key end

     0   :  { %11 = vsyncpa [#allocation4], 0  ;;  %s2700_s24 = smov [#allocation3]   ;;  %s2701_s26 = smov 128   ;;  %s3497_s0 = inlined_call_operand.vmem [shape: s32[64,1], index: 0, kind: input, shape index: {}]   ;;  %s3498_s1 = inlined_call_operand.hbm [shape: f32[128,128], index: 1, kind: input, shape index: {}]   ;;  %s3499_s2 = inlined_call_operand.vmem [shape: f32[1,128], index: 2, kind: input, shape index: {}]   ;;  %s3500_s3 = inlined_call_operand.vmem [shape: f32[32,128], index: 3, kind: input, shape index: {}]   ;;  %s3501_s4 = inlined_call_operand.vmem [shape: f32[32,128], index: 4, kind: input, shape index: {}]   ;;  %s3502_s5 = inlined_call_operand.vmem [shape: f32[1,128], index: 5, kind: input, shape index: {}]   ;;  %s3503_s6 = inlined_call_operand.vmem [shape: f32[8,128], index: 6, kind: output, shape index: {}]  }
   0x1   :  { %s18_s23 = sshll.u32 %s3498_s1, 4  ;;  %s20_s25 = sshll.u32 %s2700_s24, 4  ;;  %s19_s23 = int_to_ptr.hbm [resolvable:$true] %s18_s23  ;;  %s21_s25 = int_to_ptr.vmem [resolvable:$true] %s20_s25 }
   0x2   :  { %s2702_s27 = smov 8  }
   0x3   :  { %26 = dma.hbm_to_vmem [thread:$0]  %s19_s23, 2048, %s21_s25, [#allocation4], %s2701_s26, %s2701_s26, %s2702_s27  }
   0x4   :  { %2698 = dma.done.wait [#allocation4], 2048  }
   0x5   :  { %2699 = vsyncadd [#allocation4], 4294965248  ;;  %v2703_v0 = vmov 0   ;;  %v41_v1 = vld [vmem:[%s3497_s0 + $0x10] sm:$0xff]  ;;  %v39_v2 = vld [vmem:[%s3497_s0] sm:$0xff]  ;;  %s2707_s20 = smov 32  }
   0x6   :  { %2602 = vset.pattern.permute.xlu1 %v2703_v0  ;;  %2601 = vset.pattern.permute.xlu0 %v2703_v0  ;;  %v43_v3 = vld [vmem:[%s3497_s0 + $0x20] sm:$0xff]  ;;  %v112_v4 = vld [vmem:[#allocation3 + $0x78] sm:$0xff]  ;;  %v111_v6 = vld [vmem:[#allocation3 + $0x70] sm:$0xff]  ;;  %vm729_vm12 = vcmask 261120  }
   0x7   :  { %2603 = vset.pattern.permute.xlu2 %v2703_v0  ;;  %56 = vperm.xlu1 %2602, %v41_v1   ;;  %v2755_v5 = vand.u32 4294901760, %v112_v4  ;;  %v110_v7 = vld [vmem:[#allocation3 + $0x68] sm:$0xff]  ;;  %v109_v8 = vld [vmem:[#allocation3 + $0x60] sm:$0xff]  ;;  %v2757_v9 = vand.u32 4294901760, %v111_v6  ;;  %v108_v12 = vld [vmem:[#allocation3 + $0x58] sm:$0xff] }
   0x8   :  { %50 = vperm.xlu0 %2601, %v39_v2   ;;  %62 = vperm.xlu2 %2603, %v43_v3   ;;  %v2759_v10 = vand.u32 4294901760, %v110_v7  ;;  %v2761_v11 = vand.u32 4294901760, %v109_v8  ;;  %v107_v13 = vld [vmem:[#allocation3 + $0x50] sm:$0xff]  ;;  %v106_v14 = vld [vmem:[#allocation3 + $0x48] sm:$0xff]  ;;  %v2767_v16 = vand.u32 4294901760, %v108_v12  ;;  %v105_v19 = vld [vmem:[#allocation3 + $0x40] sm:$0xff] }
   0x9   :  { %v2764_v15 = vsub.f32 %v112_v4, %v2755_v5  ;;  %433 = vmatpush.msra.mxu3 %v2755_v5  ;;  %118 = vmatpush.msra.mxu0 %v2755_v5  ;;  %v2770_v17 = vand.u32 4294901760, %v107_v13  ;;  %v2772_v18 = vand.u32 4294901760, %v106_v14  ;;  %v42_v20 = vld [vmem:[%s3497_s0 + $0x18] sm:$0xff]  ;;  %v40_v21 = vld [vmem:[%s3497_s0 + $0x8] sm:$0xff]  ;;  %v2781_v22 = vsub.f32 %v111_v6, %v2757_v9  ;;  %v103_v41 = vld [vmem:[#allocation3 + $0x30] sm:$0xff] }
   0xa   :  { %v2784_v23 = vsub.f32 %v110_v7, %v2759_v10  ;;  %v2787_v24 = vsub.f32 %v109_v8, %v2761_v11  ;;  %v2793_v26 = vsub.f32 %v108_v12, %v2767_v16  ;;  %v2795_v27 = vand.u32 4294901760, %v105_v19  ;;  %v44_v28 = vld [vmem:[%s3497_s0 + $0x28] sm:$0xff]  ;;  %v104_v38 = vld [vmem:[#allocation3 + $0x38] sm:$0xff]  ;;  %v101_v48 = vld [vmem:[#allocation3 + $0x20] sm:$0xff] }
   0xb   :  { %v216_v25 = vand.u32 4294901760, %v2764_v15  ;;  %345 = vmatpush.msra.mxu2 %v2764_v15  ;;  %435 = vmatpush.msra.mxu3 %v2757_v9  ;;  %v222_v29 = vand.u32 4294901760, %v2781_v22  ;;  %v2804_v32 = vsub.f32 %v107_v13, %v2770_v17  ;;  %v2811_v34 = vsub.f32 %v106_v14, %v2772_v18  ;;  %v102_v42 = vld [vmem:[#allocation3 + $0x28] sm:$0xff]  ;;  %v46_v49 = vld [vmem:[%s3497_s0 + $0x38] sm:$0xff]  ;;  %v45_v50 = vld [vmem:[%s3497_s0 + $0x30] sm:$0xff] }
   0xc   :  { %v228_v30 = vand.u32 4294901760, %v2784_v23  ;;  %v234_v31 = vand.u32 4294901760, %v2787_v24  ;;  %120 = vmatpush.msra.mxu0 %v2757_v9  ;;  %v240_v37 = vand.u32 4294901760, %v2793_v26  ;;  %v2824_v40 = vsub.f32 %v105_v19, %v2795_v27  ;;  %v100_v57 = vld [vmem:[#allocation3 + $0x18] sm:$0xff]  ;;  %v99_v63 = vld [vmem:[#allocation3 + $0x10] sm:$0xff]  ;;  %v98_v6 = vld [vmem:[#allocation3 + $0x8] sm:$0xff] }
   0xd   :  { %v217_v33 = vsub.f32 %v2764_v15, %v216_v25  ;;  %v223_v35 = vsub.f32 %v2781_v22, %v222_v29  ;;  %348 = vmatpush.msra.mxu2 %v2781_v22  ;;  %437 = vmatpush.msra.mxu3 %v2759_v10  ;;  %v246_v45 = vand.u32 4294901760, %v2804_v32  ;;  %v252_v46 = vand.u32 4294901760, %v2811_v34 }
   0xe   :  { %v229_v36 = vsub.f32 %v2784_v23, %v228_v30  ;;  %122 = vmatpush.msra.mxu0 %v2759_v10  ;;  %v235_v44 = vsub.f32 %v2787_v24, %v234_v31  ;;  %v2834_v47 = vand.u32 4294901760, %v104_v38  ;;  %v241_v52 = vsub.f32 %v2793_v26, %v240_v37 }
   0xf   :  { %59 = vperm.xlu1 %2602, %v42_v20   ;;  %v218_v39 = vand.u32 4294901760, %v217_v33  ;;  %v224_v43 = vand.u32 4294901760, %v223_v35  ;;  %351 = vmatpush.msra.mxu2 %v2784_v23  ;;  %v2847_v53 = vand.u32 4294901760, %v103_v41  ;;  %v2849_v54 = vand.u32 4294901760, %v102_v42 }
  0x10   :  { %53 = vperm.xlu0 %2601, %v40_v21   ;;  %65 = vperm.xlu2 %2603, %v44_v28   ;;  %v230_v51 = vand.u32 4294901760, %v229_v36  ;;  %v258_v55 = vand.u32 4294901760, %v2824_v40  ;;  %v2853_v56 = vsub.f32 %v104_v38, %v2834_v47  ;;  %v236_v58 = vand.u32 4294901760, %v235_v44 }
  0x11   :  { %439 = vmatpush.msra.mxu3 %v2761_v11  ;;  %219 = vmatpush.msra.mxu1 %v218_v39  ;;  %v247_v59 = vsub.f32 %v2804_v32, %v246_v45  ;;  %v2862_v60 = vsub.f32 %v103_v41, %v2847_v53  ;;  %v2864_v61 = vand.u32 4294901760, %v101_v48  ;;  %v253_v62 = vsub.f32 %v2811_v34, %v252_v46 }
  0x12   :  { %124 = vmatpush.msra.mxu0 %v2761_v11  ;;  %354 = vmatpush.msra.mxu2 %v2787_v24  ;;  %v242_v0 = vand.u32 4294901760, %v241_v52  ;;  %v264_v1 = vand.u32 4294901760, %v2853_v56  ;;  %v2872_v2 = vsub.f32 %v102_v42, %v2849_v54  ;;  %v2874_v3 = vand.u32 4294901760, %v100_v57 }
  0x13   :  { %441 = vmatpush.msra.mxu3 %v2767_v16  ;;  %225 = vmatpush.msra.mxu1 %v224_v43  ;;  %v259_v4 = vsub.f32 %v2824_v40, %v258_v55  ;;  %v248_v7 = vand.u32 4294901760, %v247_v59  ;;  %v270_v8 = vand.u32 4294901760, %v2862_v60  ;;  %v2884_v12 = vsub.f32 %v101_v48, %v2864_v61 }
  0x14   :  { %126 = vmatpush.msra.mxu0 %v2767_v16  ;;  %357 = vmatpush.msra.mxu2 %v2793_v26  ;;  %v2886_v13 = vand.u32 4294901760, %v99_v63  ;;  %v254_v14 = vand.u32 4294901760, %v253_v62  ;;  %v265_v19 = vsub.f32 %v2853_v56, %v264_v1  ;;  %v276_v20 = vand.u32 4294901760, %v2872_v2 }
  0x15   :  { %443 = vmatpush.msra.mxu3 %v2770_v17  ;;  %231 = vmatpush.msra.mxu1 %v230_v51  ;;  %v2896_v21 = vsub.f32 %v100_v57, %v2874_v3  ;;  %v2898_v28 = vand.u32 4294901760, %v98_v6  ;;  %v260_v33 = vand.u32 4294901760, %v259_v4  ;;  %v271_v35 = vsub.f32 %v2862_v60, %v270_v8  ;;  %v97_v4 = vld [vmem:[#allocation3] sm:$0xff] }
  0x16   :  { %360 = vmatpush.msra.mxu2 %v2804_v32  ;;  %128 = vmatpush.msra.mxu0 %v2770_v17  ;;  %v282_v36 = vand.u32 4294901760, %v2884_v12  ;;  %v2908_v38 = vsub.f32 %v99_v63, %v2886_v13  ;;  %v266_v39 = vand.u32 4294901760, %v265_v19  ;;  %v277_v41 = vsub.f32 %v2872_v2, %v276_v20 }
  0x17   :  { %71 = vperm.xlu1 %2602, %v46_v49   ;;  %445 = vmatpush.msra.mxu3 %v2772_v18  ;;  %v288_v42 = vand.u32 4294901760, %v2896_v21  ;;  %v2918_v43 = vsub.f32 %v98_v6, %v2898_v28  ;;  %v272_v44 = vand.u32 4294901760, %v271_v35  ;;  %v147_v6 = vand.u32 4294901760, %v97_v4 }
  0x18   :  { %68 = vperm.xlu0 %2601, %v45_v50   ;;  %237 = vmatpush.msra.mxu1 %v236_v58  ;;  %v283_v48 = vsub.f32 %v2884_v12, %v282_v36  ;;  %v294_v49 = vand.u32 4294901760, %v2908_v38  ;;  %v278_v50 = vand.u32 4294901760, %v277_v41  ;;  %v2705_v15 = vmov 0.0  }
  0x19   :  { %363 = vmatpush.msra.mxu2 %v2811_v34  ;;  %447 = vmatpush.msra.mxu3 %v2795_v27  ;;  %v289_v51 = vsub.f32 %v2896_v21, %v288_v42  ;;  %v300_v52 = vand.u32 4294901760, %v2918_v43 }
  0x1a   :  { %130 = vmatpush.msra.mxu0 %v2772_v18  ;;  %243 = vmatpush.msra.mxu1 %v242_v0  ;;  %v284_v57 = vand.u32 4294901760, %v283_v48  ;;  %v295_v58 = vsub.f32 %v2908_v38, %v294_v49 }
  0x1b   :  { %366 = vmatpush.msra.mxu2 %v2824_v40  ;;  %449 = vmatpush.msra.mxu3 %v2834_v47  ;;  %v290_v59 = vand.u32 4294901760, %v289_v51  ;;  %v301_v62 = vsub.f32 %v2918_v43, %v300_v52 }
  0x1c   :  { %132 = vmatpush.msra.mxu0 %v2795_v27  ;;  %249 = vmatpush.msra.mxu1 %v248_v7  ;;  %v296_v63 = vand.u32 4294901760, %v295_v58  ;;  %v305_v7 = vsub.f32 %v97_v4, %v147_v6 }
  0x1d   :  { %369 = vmatpush.msra.mxu2 %v2853_v56  ;;  %451 = vmatpush.msra.mxu3 %v2847_v53  ;;  %v302_v0 = vand.u32 4294901760, %v301_v62 }
  0x1e   :  { %134 = vmatpush.msra.mxu0 %v2834_v47  ;;  %255 = vmatpush.msra.mxu1 %v254_v14  ;;  %v306_v14 = vand.u32 4294901760, %v305_v7 }
  0x1f   :  { %372 = vmatpush.msra.mxu2 %v2862_v60  ;;  %453 = vmatpush.msra.mxu3 %v2849_v54 }
  0x20   :  { %136 = vmatpush.msra.mxu0 %v2847_v53  ;;  %261 = vmatpush.msra.mxu1 %v260_v33  ;;  %v307_v19 = vsub.f32 %v305_v7, %v306_v14 }
  0x21   :  { %375 = vmatpush.msra.mxu2 %v2872_v2  ;;  %455 = vmatpush.msra.mxu3 %v2864_v61 }
  0x22   :  { %138 = vmatpush.msra.mxu0 %v2849_v54  ;;  %267 = vmatpush.msra.mxu1 %v266_v39  ;;  %v308_v33 = vand.u32 4294901760, %v307_v19 }
  0x23   :  { %378 = vmatpush.msra.mxu2 %v2884_v12  ;;  %457 = vmatpush.msra.mxu3 %v2874_v3 }
  0x24   :  { %140 = vmatpush.msra.mxu0 %v2864_v61  ;;  %273 = vmatpush.msra.mxu1 %v272_v44 }
  0x25   :  { %381 = vmatpush.msra.mxu2 %v2896_v21  ;;  %459 = vmatpush.msra.mxu3 %v2886_v13 }
  0x26   :  { %142 = vmatpush.msra.mxu0 %v2874_v3  ;;  %279 = vmatpush.msra.mxu1 %v278_v50 }
  0x27   :  { %384 = vmatpush.msra.mxu2 %v2908_v38  ;;  %461 = vmatpush.msra.mxu3 %v2898_v28 }
  0x28   :  { %144 = vmatpush.msra.mxu0 %v2886_v13  ;;  %285 = vmatpush.msra.mxu1 %v284_v57 }
  0x29   :  { %387 = vmatpush.msra.mxu2 %v2918_v43  ;;  %463 = vmatpush.msra.mxu3 %v147_v6 }
  0x2a   :  { %146 = vmatpush.msra.mxu0 %v2898_v28  ;;  %291 = vmatpush.msra.mxu1 %v290_v59 }
  0x2b   :  { %390 = vmatpush.msra.mxu2 %v305_v7 }
  0x2c   :  { %297 = vmatpush.msra.mxu1 %v296_v63  ;;  %148 = vmatpush.msra.mxu0 %v147_v6 }
  0x2e   :  { %303 = vmatpush.msra.mxu1 %v302_v0  ;;  %516 = vmatpush.msrb.mxu0 %v216_v25  ;;  %v2604_v0 = vld [vmem:[%s3499_s2] ss:$0 sm:$0xff]  ;;  %s2706_s2 = smov 64  }
  0x30   :  { %520 = vmatpush.msrb.mxu0 %v222_v29  ;;  %309 = vmatpush.msra.mxu1 %v308_v33 }
  0x32   :  { %524 = vmatpush.msrb.mxu0 %v228_v30  ;;  %611 = vmatpush.msrb.mxu1 %v2755_v5  ;;  %v47_v5 = vlaneseq }
  0x34   :  { %528 = vmatpush.msrb.mxu0 %v234_v31  ;;  %613 = vmatpush.msrb.mxu1 %v2757_v9  ;;  %v2986_v9 = vand.u32 127, %v47_v5 }
  0x36   :  { %532 = vmatpush.msrb.mxu0 %v240_v37  ;;  %615 = vmatpush.msrb.mxu1 %v2759_v10 }
  0x38   :  { %536 = vmatpush.msrb.mxu0 %v246_v45  ;;  %617 = vmatpush.msrb.mxu1 %v2761_v11  ;;  %v2704_v11 = vmov 1.0  }
  0x3a   :  { %540 = vmatpush.msrb.mxu0 %v252_v46  ;;  %619 = vmatpush.msrb.mxu1 %v2767_v16 }
  0x3c   :  { %544 = vmatpush.msrb.mxu0 %v258_v55  ;;  %621 = vmatpush.msrb.mxu1 %v2770_v17 }
  0x3e   :  { %548 = vmatpush.msrb.mxu0 %v264_v1  ;;  %623 = vmatpush.msrb.mxu1 %v2772_v18 }
  0x40   :  { %552 = vmatpush.msrb.mxu0 %v270_v8  ;;  %625 = vmatpush.msrb.mxu1 %v2795_v27 }
  0x42   :  { %556 = vmatpush.msrb.mxu0 %v276_v20  ;;  %627 = vmatpush.msrb.mxu1 %v2834_v47 }
  0x44   :  { %560 = vmatpush.msrb.mxu0 %v282_v36  ;;  %629 = vmatpush.msrb.mxu1 %v2847_v53 }
  0x46   :  { %564 = vmatpush.msrb.mxu0 %v288_v42  ;;  %631 = vmatpush.msrb.mxu1 %v2849_v54 }
  0x48   :  { %568 = vmatpush.msrb.mxu0 %v294_v49  ;;  %633 = vmatpush.msrb.mxu1 %v2864_v61 }
  0x4a   :  { %572 = vmatpush.msrb.mxu0 %v300_v52  ;;  %635 = vmatpush.msrb.mxu1 %v2874_v3 }
  0x4c   :  { %576 = vmatpush.msrb.mxu0 %v306_v14  ;;  %637 = vmatpush.msrb.mxu1 %v2886_v13 }
  0x4e   :  { %639 = vmatpush.msrb.mxu1 %v2898_v28 }
  0x50   :  { %641 = vmatpush.msrb.mxu1 %v147_v6 }
  0x62   :  { %v3029_v45 = vpop.permute.xlu2 %62 }
  0x63   :  { %vm77_vm4 = vcmp.eq.s32.totalorder %v2986_v9, %v3029_v45 }
  0x64   :  { %v2556_v56 = vsel %vm77_vm4, 1.0, %v2705_v15 }
  0x65   :  { %v182_v1 = vsub.f32 %v2556_v56, %v2556_v56 }
  0x67   :  { %v183_v3 = vand.u32 4294901760, %v182_v1 }
  0x69   :  { %v184_v13 = vsub.f32 %v182_v1, %v183_v3 }
  0x6a   :  { %v66_v60 = vpop.permute.xlu2 %65 }
  0x6b   :  { %vm78_vm5 = vcmp.eq.s32.totalorder %v2986_v9, %v66_v60  ;;  %v185_v21 = vand.u32 4294901760, %v184_v13 }
  0x6c   :  { %v2557_v8 = vsel %vm78_vm5, 1.0, %v2705_v15 }
  0x6d   :  { %v190_v20 = vsub.f32 %v2557_v8, %v2557_v8 }
  0x6f   :  { %v191_v28 = vand.u32 4294901760, %v190_v20 }
  0x71   :  { %v192_v38 = vsub.f32 %v190_v20, %v191_v28 }
  0x73   :  { %v193_v41 = vand.u32 4294901760, %v192_v38 }
  0x79   :  { %v3001_v18 = vpop.permute.xlu1 %56 }
  0x7a   :  { %v2989_v10 = vpop.permute.xlu0 %50  ;;  %vm75_vm1 = vcmp.eq.s32.totalorder %v2986_v9, %v3001_v18 }
  0x7b   :  { %vm73_vm0 = vcmp.eq.s32.totalorder %v2986_v9, %v2989_v10  ;;  %v2554_v27 = vsel %vm75_vm1, 1.0, %v2705_v15 }
  0x7c   :  { %2560 = vmatmul.msk.f32.vlgmr.msra.gmra.mxu1 %vm73_vm0, %v2704_v11  ;;  %v2552_v16 = vsel %vm73_vm0, 1.0, %v2705_v15  ;;  %v166_v31 = vsub.f32 %v2554_v27, %v2554_v27 }
  0x7d   :  { %v150_v17 = vsub.f32 %v2552_v16, %v2552_v16 }
  0x7e   :  { %v167_v40 = vand.u32 4294901760, %v166_v31 }
  0x7f   :  { %393 = vmatmul.f32.vlgmr.msra.gmra.mxu2 %v150_v17  ;;  %v151_v22 = vand.u32 4294901760, %v150_v17 }
  0x80   :  { %v168_v47 = vsub.f32 %v166_v31, %v167_v40 }
  0x81   :  { %467 = vmatmul.f32.vlgmr.msra.gmra.mxu3 %v151_v22  ;;  %v152_v23 = vsub.f32 %v150_v17, %v151_v22  ;;  %v3021_v32 = vpop.permute.xlu1 %59 }
  0x82   :  { %v3005_v24 = vpop.permute.xlu0 %53  ;;  %vm76_vm3 = vcmp.eq.s32.totalorder %v2986_v9, %v3021_v32  ;;  %v169_v54 = vand.u32 4294901760, %v168_v47 }
  0x83   :  { %vm74_vm2 = vcmp.eq.s32.totalorder %v2986_v9, %v3005_v24  ;;  %v153_v25 = vand.u32 4294901760, %v152_v23  ;;  %v2555_v46 = vsel %vm76_vm3, 1.0, %v2705_v15 }
  0x84   :  { %2561 = vmatmul.msk.f32.gmra.mxu1 %vm74_vm2, %v2704_v11  ;;  %v2553_v26 = vsel %vm74_vm2, 1.0, %v2705_v15  ;;  %v174_v53 = vsub.f32 %v2555_v46, %v2555_v46 }
  0x85   :  { %154 = vmatmul.f32.vlgmr.msra.gmra.mxu0 %v153_v25  ;;  %v158_v29 = vsub.f32 %v2553_v26, %v2553_v26 }
  0x86   :  { %v175_v55 = vand.u32 4294901760, %v174_v53 }
  0x87   :  { %398 = vmatmul.f32.gmra.mxu2 %v158_v29  ;;  %v159_v30 = vand.u32 4294901760, %v158_v29 }
  0x88   :  { %v176_v61 = vsub.f32 %v174_v53, %v175_v55 }
  0x89   :  { %473 = vmatmul.f32.gmra.mxu3 %v159_v30  ;;  %v160_v34 = vsub.f32 %v158_v29, %v159_v30  ;;  %v72_v36 = vpop.permute.xlu1 %71 }
  0x8a   :  { %v177_v2 = vand.u32 4294901760, %v176_v61  ;;  %v69_v12 = vpop.permute.xlu0 %68  ;;  %vm80_vm7 = vcmp.eq.s32.totalorder %v2986_v9, %v72_v36 }
  0x8b   :  { %v161_v37 = vand.u32 4294901760, %v160_v34  ;;  %vm79_vm6 = vcmp.eq.s32.totalorder %v2986_v9, %v69_v12  ;;  %v2559_v43 = vsel %vm80_vm7, 1.0, %v2705_v15 }
  0x8c   :  { %2562 = vmatmul.msk.f32.gmra.mxu1 %vm75_vm1, %v2704_v11  ;;  %v2558_v35 = vsel %vm79_vm6, 1.0, %v2705_v15  ;;  %v206_v48 = vsub.f32 %v2559_v43, %v2559_v43 }
  0x8d   :  { %162 = vmatmul.f32.gmra.mxu0 %v161_v37  ;;  %v198_v39 = vsub.f32 %v2558_v35, %v2558_v35 }
  0x8e   :  { %v207_v50 = vand.u32 4294901760, %v206_v48 }
  0x8f   :  { %403 = vmatmul.f32.gmra.mxu2 %v166_v31  ;;  %v199_v42 = vand.u32 4294901760, %v198_v39 }
  0x90   :  { %v208_v51 = vsub.f32 %v206_v48, %v207_v50 }
  0x91   :  { %479 = vmatmul.f32.gmra.mxu3 %v167_v40  ;;  %v200_v44 = vsub.f32 %v198_v39, %v199_v42 }
  0x92   :  { %v209_v52 = vand.u32 4294901760, %v208_v51 }
  0x93   :  { %v201_v49 = vand.u32 4294901760, %v200_v44 }
  0x94   :  { %2563 = vmatmul.msk.f32.gmra.mxu1 %vm76_vm3, %v2704_v11 }
  0x95   :  { %170 = vmatmul.f32.gmra.mxu0 %v169_v54 }
  0x97   :  { %408 = vmatmul.f32.gmra.mxu2 %v174_v53 }
  0x99   :  { %485 = vmatmul.f32.gmra.mxu3 %v175_v55 }
  0x9c   :  { %2564 = vmatmul.msk.f32.gmra.mxu1 %vm77_vm4, %v2704_v11 }
  0x9d   :  { %178 = vmatmul.f32.gmra.mxu0 %v177_v2 }
  0x9f   :  { %413 = vmatmul.f32.gmra.mxu2 %v182_v1 }
  0xa1   :  { %491 = vmatmul.f32.gmra.mxu3 %v183_v3 }
  0xa4   :  { %2565 = vmatmul.msk.f32.gmra.mxu1 %vm78_vm5, %v2704_v11 }
  0xa5   :  { %186 = vmatmul.f32.gmra.mxu0 %v185_v21 }
  0xa7   :  { %418 = vmatmul.f32.gmra.mxu2 %v190_v20 }
  0xa9   :  { %497 = vmatmul.f32.gmra.mxu3 %v191_v28 }
  0xac   :  { %2566 = vmatmul.msk.f32.gmra.mxu1 %vm79_vm6, %v2704_v11 }
  0xad   :  { %194 = vmatmul.f32.gmra.mxu0 %v193_v41 }
  0xaf   :  { %423 = vmatmul.f32.gmra.mxu2 %v198_v39 }
  0xb1   :  { %503 = vmatmul.f32.gmra.mxu3 %v199_v42 }
  0xb4   :  { %2567 = vmatmul.msk.f32.gmra.mxu1 %vm80_vm7, %v2704_v11 }
  0xb5   :  { %202 = vmatmul.f32.gmra.mxu0 %v201_v49 }
  0xb7   :  { %428 = vmatmul.f32.gmra.mxu2 %v206_v48 }
  0xb9   :  { %509 = vmatmul.f32.gmra.mxu3 %v207_v50 }
  0xbc   :  { %2576 = vmatmul.msk.f32.vlgmr.msrb.gmra.mxu1 %vm73_vm0, %v2704_v11 }
  0xbd   :  { %210 = vmatmul.f32.gmra.mxu0 %v209_v52 }
  0xc4   :  { %2577 = vmatmul.msk.f32.gmra.mxu1 %vm74_vm2, %v2704_v11 }
  0xc5   :  { %2568 = vmatmul.msk.f32.vlgmr.msrb.gmra.mxu0 %vm73_vm0, %v2704_v11 }
  0xcc   :  { %2578 = vmatmul.msk.f32.gmra.mxu1 %vm75_vm1, %v2704_v11 }
  0xcd   :  { %2569 = vmatmul.msk.f32.gmra.mxu0 %vm74_vm2, %v2704_v11 }
  0xd4   :  { %2579 = vmatmul.msk.f32.gmra.mxu1 %vm76_vm3, %v2704_v11 }
  0xd5   :  { %2570 = vmatmul.msk.f32.gmra.mxu0 %vm75_vm1, %v2704_v11 }
  0xdc   :  { %2580 = vmatmul.msk.f32.gmra.mxu1 %vm77_vm4, %v2704_v11 }
  0xdd   :  { %2571 = vmatmul.msk.f32.gmra.mxu0 %vm76_vm3, %v2704_v11 }
  0xe4   :  { %2581 = vmatmul.msk.f32.gmra.mxu1 %vm78_vm5, %v2704_v11 }
  0xe5   :  { %2572 = vmatmul.msk.f32.gmra.mxu0 %vm77_vm4, %v2704_v11 }
  0xec   :  { %2582 = vmatmul.msk.f32.gmra.mxu1 %vm79_vm6, %v2704_v11 }
  0xed   :  { %2573 = vmatmul.msk.f32.gmra.mxu0 %vm78_vm5, %v2704_v11 }
  0xf4   :  { %2583 = vmatmul.msk.f32.gmra.mxu1 %vm80_vm7, %v2704_v11 }
  0xf5   :  { %2574 = vmatmul.msk.f32.gmra.mxu0 %vm79_vm6, %v2704_v11 }
  0xf9   :  { %v312_v57 = vpop.f32.mrf.mxu1 }
  0xfd   :  { %2575 = vmatmul.msk.f32.gmra.mxu0 %vm80_vm7, %v2704_v11 }
 0x101   :  { %v316_v58 = vpop.f32.mrf.mxu1 }
 0x102   :  { %v155_v59 = vpop.f32.mrf.mxu0  ;;  %v394_v62 = vpop.f32.mrf.mxu2 }
 0x103   :  { %v156_v21 = vadd.f32 %v2604_v0, %v155_v59 }
 0x104   :  { %v468_v63 = vpop.f32.mrf.mxu3 }
 0x105   :  { %v313_v39 = vadd.f32 %v312_v57, %v156_v21 }
 0x107   :  { %v395_v48 = vadd.f32 %v394_v62, %v313_v39 }
 0x109   :  { %v320_v4 = vpop.f32.mrf.mxu1  ;;  %v469_v50 = vadd.f32 %v468_v63, %v395_v48 }
 0x10a   :  { %v163_v6 = vpop.f32.mrf.mxu0  ;;  %v399_v7 = vpop.f32.mrf.mxu2 }
 0x10b   :  { %v164_v14 = vadd.f32 %v2604_v0, %v163_v6 }
 0x10c   :  { %v474_v19 = vpop.f32.mrf.mxu3 }
 0x10d   :  { %v317_v33 = vadd.f32 %v316_v58, %v164_v14 }
 0x10f   :  { %v400_v5 = vadd.f32 %v399_v7, %v317_v33 }
 0x111   :  { %v3131_v10 = vadd.f32 %v474_v19, %v400_v5  ;;  %v324_v15 = vpop.f32.mrf.mxu1 }
 0x112   :  { %v171_v9 = vpop.f32.mrf.mxu0  ;;  %v404_v11 = vpop.f32.mrf.mxu2 }
 0x113   :  { %v172_v16 = vadd.f32 %v2604_v0, %v171_v9 }
 0x114   :  { %v480_v17 = vpop.f32.mrf.mxu3 }
 0x115   :  { %v321_v18 = vadd.f32 %v320_v4, %v172_v16 }
 0x117   :  { %v405_v22 = vadd.f32 %v404_v11, %v321_v18 }
 0x119   :  { %v3133_v23 = vadd.f32 %v480_v17, %v405_v22  ;;  %v328_v24 = vpop.f32.mrf.mxu1 }
 0x11a   :  { %v179_v25 = vpop.f32.mrf.mxu0  ;;  %v409_v26 = vpop.f32.mrf.mxu2 }
 0x11b   :  { %v180_v27 = vadd.f32 %v2604_v0, %v179_v25 }
 0x11c   :  { %v486_v29 = vpop.f32.mrf.mxu3 }
 0x11d   :  { %v325_v30 = vadd.f32 %v324_v15, %v180_v27 }
 0x11f   :  { %v410_v31 = vadd.f32 %v409_v26, %v325_v30 }
 0x121   :  { %v3135_v32 = vadd.f32 %v486_v29, %v410_v31  ;;  %v332_v34 = vpop.f32.mrf.mxu1 }
 0x122   :  { %v187_v37 = vpop.f32.mrf.mxu0  ;;  %v414_v40 = vpop.f32.mrf.mxu2 }
 0x123   :  { %v188_v45 = vadd.f32 %v2604_v0, %v187_v37 }
 0x124   :  { %v492_v46 = vpop.f32.mrf.mxu3 }
 0x125   :  { %v329_v47 = vadd.f32 %v328_v24, %v188_v45 }
 0x127   :  { %v415_v53 = vadd.f32 %v414_v40, %v329_v47 }
 0x129   :  { %v493_v54 = vadd.f32 %v492_v46, %v415_v53  ;;  %v336_v55 = vpop.f32.mrf.mxu1 }
 0x12a   :  { %v195_v56 = vpop.f32.mrf.mxu0  ;;  %v419_v61 = vpop.f32.mrf.mxu2 }
 0x12b   :  { %v196_v60 = vadd.f32 %v2604_v0, %v195_v56 }
 0x12c   :  { %v498_v2 = vpop.f32.mrf.mxu3 }
 0x12d   :  { %v333_v1 = vadd.f32 %v332_v34, %v196_v60 }
 0x12f   :  { %v420_v3 = vadd.f32 %v419_v61, %v333_v1  ;;  %v686_v1 = vld [vmem:[%s3500_s3 + $0x18] sm:$0xff] }
 0x131   :  { %v499_v8 = vadd.f32 %v498_v2, %v420_v3  ;;  %v340_v12 = vpop.f32.mrf.mxu1  ;;  %v685_v2 = vld [vmem:[%s3500_s3 + $0x10] sm:$0xff]  ;;  %v684_v3 = vld [vmem:[%s3500_s3 + $0x8] sm:$0xff] }
 0x132   :  { %v203_v13 = vpop.f32.mrf.mxu0  ;;  %v424_v35 = vpop.f32.mrf.mxu2 }
 0x133   :  { %v204_v20 = vadd.f32 %v2604_v0, %v203_v13  ;;  %v3180_v13 = vand.u32 4294901760, %v684_v3 }
 0x134   :  { %v504_v38 = vpop.f32.mrf.mxu3 }
 0x135   :  { %v337_v28 = vadd.f32 %v336_v55, %v204_v20  ;;  %v683_v20 = vld [vmem:[%s3500_s3] sm:$0xff] }
 0x136   :  { %v3185_v21 = vand.u32 4294901760, %v683_v20 }
 0x137   :  { %v425_v36 = vadd.f32 %v424_v35, %v337_v28 }
 0x139   :  { %v505_v41 = vadd.f32 %v504_v38, %v425_v36  ;;  %v644_v42 = vpop.f32.mrf.mxu1  ;;  %v3195_v36 = vsub.f32 %v684_v3, %v3180_v13  ;;  %v3199_v38 = vsub.f32 %v683_v20, %v3185_v21 }
 0x13a   :  { %v211_v43 = vpop.f32.mrf.mxu0 }
 0x13b   :  { %v212_v44 = vadd.f32 %v2604_v0, %v211_v43  ;;  %v3213_v43 = vand.u32 4294901760, %v3199_v38 }
 0x13d   :  { %v3137_v49 = vadd.f32 %v340_v12, %v212_v44  ;;  %v3178_v12 = vand.u32 4294901760, %v685_v2 }
 0x13f   :  { %v3192_v35 = vsub.f32 %v685_v2, %v3178_v12 }
 0x141   :  { %v3139_v51 = vpop.f32.mrf.mxu1 }
 0x142   :  { %v579_v52 = vpop.f32.mrf.mxu0 }
 0x143   :  { %v580_v58 = vadd.f32 %v579_v52, %v469_v50 }
 0x145   :  { %v645_v4 = vadd.f32 %v644_v42, %v580_v58  ;;  %v3209_v42 = vand.u32 4294901760, %v3195_v36 }
 0x147   :  { %2606 = vtanh.f32 %v645_v4  ;;  %v2584_v24 = vmul.f32 -1.442695, %v645_v4  ;;  %v788_v50 = vsub.f32 %v3195_v36, %v3209_v42  ;;  %v794_v4 = vsub.f32 %v3199_v38, %v3213_v43 }
 0x149   :  { %v3143_v6 = vpop.f32.mrf.mxu1  ;;  %2608 = vpow2.f32 %v2584_v24 }
 0x14a   :  { %v3141_v59 = vpop.f32.mrf.mxu0 }
 0x14d   :  { %v2607_v7 = vpop.eup %2606 }
 0x14e   :  { %710 = vrot.lane.b32.xlu2 %v2607_v7, %s2706_s2  ;;  %v3235_v7 = vand.u32 4294901760, %v788_v50 }
 0x14f   :  { %v2609_v25 = vpop.eup %2608 }
 0x150   :  { %v691_v26 = vadd.f32 1.0, %v2609_v25  ;;  %v3286_v25 = vpop.f32.mrf.mxu3 }
 0x151   :  { %v3148_v62 = vpop.f32.mrf.mxu1 }
 0x152   :  { %v3146_v57 = vpop.f32.mrf.mxu0  ;;  %2610 = vrcp.f32 %v691_v26  ;;  %v703_v37 = vand.u32 2147483648, %v691_v26  ;;  %vm697_vm9 = vweird.f32 %v691_v26  ;;  %v701_v40 = vand.u32 2147483647, %v691_v26 }
 0x154   :  { %v704_v46 = vor.u32 1.1754944e-38, %v703_v37  ;;  %vm702_vm11 = vcmp.eq.f32.partialorder %v701_v40, 8.507059e+37  ;;  %v584_v40 = vadd.f32 %v3141_v59, %v3131_v10 }
 0x158   :  { %v2611_v27 = vpop.eup %2610 }
 0x159   :  { %v660_v63 = vpop.f32.mrf.mxu1  ;;  %v693_v29 = vmul.f32 %v2611_v27, %v691_v26  ;;  %vm698_vm8 = vweird.f32 %v2611_v27  ;;  %v3288_v26 = vpop.f32.mrf.mxu2 }
 0x15a   :  { %v3150_v0 = vpop.f32.mrf.mxu0  ;;  %vm699_vm10 = vmor %vm697_vm9, %vm698_vm8 }
 0x15b   :  { %v694_v30 = vsub.f32 1.0, %v693_v29 }
 0x15d   :  { %v695_v31 = vmul.f32 %v2611_v27, %v694_v30 }
 0x15f   :  { %v696_v34 = vadd.f32 %v2611_v27, %v695_v31 }
 0x161   :  { %v664_v5 = vpop.f32.mrf.mxu1  ;;  %v700_v45 = vsel %vm699_vm10, %v2611_v27, %v696_v34 }
 0x162   :  { %v595_v14 = vpop.f32.mrf.mxu0  ;;  %v3158_v53 = vsel %vm702_vm11, %v704_v46, %v700_v45 }
 0x163   :  { %v596_v19 = vadd.f32 %v595_v14, %v493_v54  ;;  %v708_v55 = vmul.f32 0.0, %v3158_v53 }
 0x165   :  { %v3152_v33 = vadd.f32 %v660_v63, %v596_v19  ;;  %v3241_v63 = vand.u32 4294901760, %v794_v4 }
 0x169   :  { %v668_v18 = vpop.f32.mrf.mxu1 }
 0x16a   :  { %v599_v15 = vpop.f32.mrf.mxu0 }
 0x16b   :  { %v600_v9 = vadd.f32 %v599_v15, %v499_v8  ;;  %v3176_v8 = vand.u32 4294901760, %v686_v1 }
 0x16d   :  { %v3154_v11 = vadd.f32 %v664_v5, %v600_v9  ;;  %745 = vmatpush.msrb.mxu2 %v3176_v8  ;;  %v3189_v28 = vsub.f32 %v686_v1, %v3176_v8  ;;  %1363 = vmatpush.msra.mxu1 %v3176_v8 }
 0x16f   :  { %v3202_v39 = vand.u32 4294901760, %v3189_v28  ;;  %747 = vmatpush.msrb.mxu2 %v3178_v12  ;;  %1365 = vmatpush.msra.mxu1 %v3178_v12 }
 0x171   :  { %v776_v44 = vsub.f32 %v3189_v28, %v3202_v39  ;;  %749 = vmatpush.msrb.mxu2 %v3180_v13  ;;  %1332 = vmatpush.msra.mxu0 %v3202_v39 }
 0x172   :  { %v603_v16 = vpop.f32.mrf.mxu0  ;;  %1367 = vmatpush.msra.mxu1 %v3180_v13 }
 0x173   :  { %v604_v17 = vadd.f32 %v603_v16, %v505_v41  ;;  %v3206_v41 = vand.u32 4294901760, %v3192_v35  ;;  %v3224_v52 = vand.u32 4294901760, %v776_v44  ;;  %751 = vmatpush.msrb.mxu2 %v3185_v21 }
 0x174   :  { %1369 = vmatpush.msra.mxu1 %v3185_v21 }
 0x175   :  { %v3156_v22 = vadd.f32 %v668_v18, %v604_v17  ;;  %v782_v48 = vsub.f32 %v3192_v35, %v3206_v41  ;;  %1336 = vmatpush.msra.mxu0 %v3206_v41  ;;  %816 = vmatpush.msra.mxu2 %v3189_v28 }
 0x176   :  { %778 = vmatpush.msrb.mxu3 %v3224_v52  ;;  %1532 = vmatpush.msrb.mxu1 %v3176_v8 }
 0x177   :  { %v3226_v58 = vand.u32 4294901760, %v782_v48  ;;  %1340 = vmatpush.msra.mxu0 %v3209_v42  ;;  %819 = vmatpush.msra.mxu2 %v3192_v35 }
 0x178   :  { %1534 = vmatpush.msrb.mxu1 %v3178_v12 }
 0x179   :  { %784 = vmatpush.msrb.mxu3 %v3226_v58  ;;  %1344 = vmatpush.msra.mxu0 %v3213_v43 }
 0x17a   :  { %822 = vmatpush.msra.mxu2 %v3195_v36  ;;  %1536 = vmatpush.msrb.mxu1 %v3180_v13 }
 0x17b   :  { %1503 = vmatpush.msrb.mxu0 %v3189_v28  ;;  %790 = vmatpush.msrb.mxu3 %v3235_v7 }
 0x17c   :  { %825 = vmatpush.msra.mxu2 %v3199_v38  ;;  %1538 = vmatpush.msrb.mxu1 %v3185_v21 }
 0x17d   :  { %1506 = vmatpush.msrb.mxu0 %v3192_v35  ;;  %796 = vmatpush.msrb.mxu3 %v3241_v63 }
 0x17f   :  { %845 = vmatpush.msra.mxu3 %v3176_v8  ;;  %1509 = vmatpush.msrb.mxu0 %v3195_v36 }
 0x181   :  { %847 = vmatpush.msra.mxu3 %v3178_v12  ;;  %1512 = vmatpush.msrb.mxu0 %v3199_v38 }
 0x183   :  { %849 = vmatpush.msra.mxu3 %v3180_v13 }
 0x185   :  { %851 = vmatpush.msra.mxu3 %v3185_v21 }
 0x1a8   :  { %v711_v47 = vpop.permute.xlu2 %710 }
 0x1a9   :  { %v713_v54 = vmul.f32 %v711_v47, %v3158_v53 }
 0x1ab   :  { %715 = vrot.lane.b32.xlu0 %v713_v54, %s2707_s20  ;;  %v649_v54 = vadd.f32 %v3139_v51, %v584_v40 }
 0x21d   :  { %v716_v56 = vpop.permute.xlu0 %715 }
 0x21e   :  { %v3163_v60 = vadd.f32 %v716_v56, %v708_v55 }
 0x220   :  { %2612 = vtanh.f32 %v3163_v60 }
 0x226   :  { %v2613_v61 = vpop.eup %2612 }
 0x227   :  { %721 = vrot.lane.b32.xlu1 %v2613_v61, %s2706_s2 }
 0x299   :  { %v722_v14 = vpop.permute.xlu1 %721 }
 0x29a   :  { %v724_v19 = vmul.f32 %v722_v14, %v3158_v53 }
 0x29c   :  { %727 = vrot.lane.b32.xlu2 %v724_v19, %s2707_s20 }
 0x2f6   :  { %v728_v5 = vpop.permute.xlu2 %727 }
 0x2f7   :  { %v730_v15 = vsel %vm729_vm12, %v728_v5, 0 }
 0x2f8   :  { %v752_v9 = vand.u32 4294901760, %v730_v15 }
 0x2fa   :  { %v753_v16 = vsub.f32 %v730_v15, %v752_v9  ;;  %798 = vmatmul.f32.vlgmr.msrb.gmra.mxu3 %v752_v9 }
 0x2fb   :  { %905 = vmatpush.msrb.mxu3 %v3176_v8 }
 0x2fc   :  { %v754_v17 = vand.u32 4294901760, %v753_v16 }
 0x2fd   :  { %907 = vmatpush.msrb.mxu3 %v3178_v12 }
 0x2fe   :  { %v755_v18 = vsub.f32 %v753_v16, %v754_v17 }
 0x2ff   :  { %909 = vmatpush.msrb.mxu3 %v3180_v13 }
 0x300   :  { %v756_v24 = vand.u32 4294901760, %v755_v18 }
 0x301   :  { %911 = vmatpush.msrb.mxu3 %v3185_v21 }
 0x302   :  { %757 = vmatmul.f32.vlgmr.msrb.gmra.mxu2 %v756_v24  ;;  %855 = vmatmul.f32.vlgmr.msra.gmra.mxu3 %v754_v17 }
 0x303   :  { %874 = vmatpush.msrb.mxu2 %v3202_v39  ;;  %1007 = vmatpush.msra.mxu3 %v3224_v52 }
 0x305   :  { %878 = vmatpush.msrb.mxu2 %v3206_v41  ;;  %1013 = vmatpush.msra.mxu3 %v3226_v58 }
 0x307   :  { %882 = vmatpush.msrb.mxu2 %v3209_v42  ;;  %1019 = vmatpush.msra.mxu3 %v3235_v7 }
 0x309   :  { %886 = vmatpush.msrb.mxu2 %v3213_v43  ;;  %1025 = vmatpush.msra.mxu3 %v3241_v63 }
 0x30a   :  { %828 = vmatmul.f32.vlgmr.msra.gmra.mxu2 %v753_v16  ;;  %913 = vmatmul.f32.vlgmr.msrb.gmra.mxu3 %v752_v9 }
 0x30b   :  { %974 = vmatpush.msra.mxu2 %v3176_v8  ;;  %1074 = vmatpush.msrb.mxu3 %v3176_v8 }
 0x30d   :  { %976 = vmatpush.msra.mxu2 %v3178_v12  ;;  %1076 = vmatpush.msrb.mxu3 %v3178_v12 }
 0x30f   :  { %978 = vmatpush.msra.mxu2 %v3180_v13  ;;  %1078 = vmatpush.msrb.mxu3 %v3180_v13 }
 0x311   :  { %980 = vmatpush.msra.mxu2 %v3185_v21  ;;  %1080 = vmatpush.msrb.mxu3 %v3185_v21 }
 0x312   :  { %888 = vmatmul.f32.vlgmr.msrb.gmra.mxu2 %v752_v9 }
 0x313   :  { %1045 = vmatpush.msrb.mxu2 %v3189_v28 }
 0x315   :  { %1048 = vmatpush.msrb.mxu2 %v3192_v35 }
 0x317   :  { %1051 = vmatpush.msrb.mxu2 %v3195_v36 }
 0x319   :  { %1054 = vmatpush.msrb.mxu2 %v3199_v38 }
 0x37d   :  { %v799_v27 = vpop.f32.mrf.mxu3 }
 0x385   :  { %v758_v29 = vpop.f32.mrf.mxu2  ;;  %v856_v30 = vpop.f32.mrf.mxu3 }
 0x386   :  { %v800_v34 = vadd.f32 %v799_v27, %v758_v29 }
 0x38d   :  { %v829_v31 = vpop.f32.mrf.mxu2  ;;  %v914_v53 = vpop.f32.mrf.mxu3 }
 0x38e   :  { %v830_v37 = vadd.f32 %v829_v31, %v800_v34 }
 0x390   :  { %v857_v45 = vadd.f32 %v856_v30, %v830_v37 }
 0x395   :  { %v889_v46 = vpop.f32.mrf.mxu2 }
 0x396   :  { %v890_v47 = vadd.f32 %v889_v46, %v857_v45 }
 0x398   :  { %v915_v55 = vadd.f32 %v914_v53, %v890_v47 }
 0x39a   :  { %v917_v56 = vadd.f32 %v915_v55, %v649_v54 }
 0x39c   :  { %2614 = vtanh.f32 %v917_v56  ;;  %v2585_v1 = vmul.f32 -1.442695, %v917_v56  ;;  %v588_v56 = vadd.f32 %v3146_v57, %v3133_v23 }
 0x39e   :  { %2616 = vpow2.f32 %v2585_v1 }
 0x3a2   :  { %v2615_v61 = vpop.eup %2614 }
 0x3a3   :  { %940 = vrot.lane.b32.xlu0 %v2615_v61, %s2706_s2 }
 0x3a4   :  { %v2617_v2 = vpop.eup %2616 }
 0x3a5   :  { %v921_v3 = vadd.f32 1.0, %v2617_v2 }
 0x3a7   :  { %2618 = vrcp.f32 %v921_v3  ;;  %v933_v50 = vand.u32 2147483648, %v921_v3  ;;  %vm927_vm14 = vweird.f32 %v921_v3  ;;  %v931_v51 = vand.u32 2147483647, %v921_v3 }
 0x3a9   :  { %v934_v14 = vor.u32 1.1754944e-38, %v933_v50  ;;  %vm932_vm0 = vcmp.eq.f32.partialorder %v931_v51, 8.507059e+37 }
 0x3ad   :  { %v2619_v20 = vpop.eup %2618 }
 0x3ae   :  { %v923_v44 = vmul.f32 %v2619_v20, %v921_v3  ;;  %vm928_vm13 = vweird.f32 %v2619_v20 }
 0x3af   :  { %vm929_vm15 = vmor %vm927_vm14, %vm928_vm13 }
 0x3b0   :  { %v924_v10 = vsub.f32 1.0, %v923_v44 }
 0x3b2   :  { %v925_v59 = vmul.f32 %v2619_v20, %v924_v10 }
 0x3b4   :  { %v926_v48 = vadd.f32 %v2619_v20, %v925_v59 }
 0x3b6   :  { %v930_v4 = vsel %vm929_vm15, %v2619_v20, %v926_v48  ;;  %v653_v20 = vadd.f32 %v3143_v6, %v588_v56  ;;  %v3362_v56 = vpop.f32.mrf.mxu0 }
 0x3b7   :  { %v935_v5 = vsel %vm932_vm0, %v934_v14, %v930_v4 }
 0x3b8   :  { %v938_v9 = vmul.f32 %v935_v5, %v3163_v60 }
 0x415   :  { %v941_v19 = vpop.permute.xlu0 %940 }
 0x416   :  { %v943_v15 = vmul.f32 %v941_v19, %v935_v5 }
 0x418   :  { %945 = vrot.lane.b32.xlu1 %v943_v15, %s2707_s20 }
 0x48a   :  { %v946_v16 = vpop.permute.xlu1 %945 }
 0x48b   :  { %v3296_v17 = vadd.f32 %v946_v16, %v938_v9 }
 0x48d   :  { %2620 = vtanh.f32 %v3296_v17 }
 0x493   :  { %v2621_v18 = vpop.eup %2620 }
 0x494   :  { %951 = vrot.lane.b32.xlu2 %v2621_v18, %s2706_s2 }
 0x4ee   :  { %v952_v24 = vpop.permute.xlu2 %951 }
 0x4ef   :  { %v954_v27 = vmul.f32 %v952_v24, %v935_v5 }
 0x4f1   :  { %957 = vrot.lane.b32.xlu0 %v954_v27, %s2707_s20 }
 0x563   :  { %v958_v29 = vpop.permute.xlu0 %957 }
 0x564   :  { %v959_v30 = vsel %vm729_vm12, %v958_v29, 0 }
 0x565   :  { %v981_v31 = vand.u32 4294901760, %v959_v30 }
 0x567   :  { %v982_v34 = vsub.f32 %v959_v30, %v981_v31  ;;  %1027 = vmatmul.f32.vlgmr.msra.gmra.mxu3 %v981_v31 }
 0x568   :  { %1134 = vmatpush.msra.mxu3 %v3176_v8 }
 0x569   :  { %v983_v60 = vand.u32 4294901760, %v982_v34 }
 0x56a   :  { %1136 = vmatpush.msra.mxu3 %v3178_v12 }
 0x56b   :  { %v984_v37 = vsub.f32 %v982_v34, %v983_v60 }
 0x56c   :  { %1138 = vmatpush.msra.mxu3 %v3180_v13 }
 0x56d   :  { %v985_v40 = vand.u32 4294901760, %v984_v37 }
 0x56e   :  { %1140 = vmatpush.msra.mxu3 %v3185_v21 }
 0x56f   :  { %986 = vmatmul.f32.vlgmr.msra.gmra.mxu2 %v985_v40  ;;  %1084 = vmatmul.f32.vlgmr.msrb.gmra.mxu3 %v983_v60 }
 0x570   :  { %1103 = vmatpush.msra.mxu2 %v3202_v39  ;;  %1236 = vmatpush.msrb.mxu3 %v3224_v52 }
 0x572   :  { %1107 = vmatpush.msra.mxu2 %v3206_v41  ;;  %1242 = vmatpush.msrb.mxu3 %v3226_v58 }
 0x574   :  { %1111 = vmatpush.msra.mxu2 %v3209_v42  ;;  %1248 = vmatpush.msrb.mxu3 %v3235_v7 }
 0x576   :  { %1115 = vmatpush.msra.mxu2 %v3213_v43  ;;  %1254 = vmatpush.msrb.mxu3 %v3241_v63 }
 0x577   :  { %1057 = vmatmul.f32.vlgmr.msrb.gmra.mxu2 %v982_v34  ;;  %1142 = vmatmul.f32.vlgmr.msra.gmra.mxu3 %v981_v31 }
 0x578   :  { %1203 = vmatpush.msrb.mxu2 %v3176_v8  ;;  %1303 = vmatpush.msra.mxu3 %v3176_v8 }
 0x57a   :  { %1205 = vmatpush.msrb.mxu2 %v3178_v12  ;;  %1305 = vmatpush.msra.mxu3 %v3178_v12 }
 0x57c   :  { %1207 = vmatpush.msrb.mxu2 %v3180_v13  ;;  %1307 = vmatpush.msra.mxu3 %v3180_v13 }
 0x57e   :  { %1209 = vmatpush.msrb.mxu2 %v3185_v21  ;;  %1309 = vmatpush.msra.mxu3 %v3185_v21 }
 0x57f   :  { %1117 = vmatmul.f32.vlgmr.msra.gmra.mxu2 %v981_v31 }
 0x580   :  { %1274 = vmatpush.msra.mxu2 %v3189_v28 }
 0x582   :  { %1277 = vmatpush.msra.mxu2 %v3192_v35 }
 0x584   :  { %1280 = vmatpush.msra.mxu2 %v3195_v36 }
 0x586   :  { %1283 = vmatpush.msra.mxu2 %v3199_v38 }
 0x5ea   :  { %v1028_v45 = vpop.f32.mrf.mxu3 }
 0x5f2   :  { %v987_v46 = vpop.f32.mrf.mxu2  ;;  %v1085_v47 = vpop.f32.mrf.mxu3 }
 0x5f3   :  { %v1029_v54 = vadd.f32 %v1028_v45, %v987_v46 }
 0x5fa   :  { %v1058_v53 = vpop.f32.mrf.mxu2  ;;  %v1143_v3 = vpop.f32.mrf.mxu3 }
 0x5fb   :  { %v1059_v55 = vadd.f32 %v1058_v53, %v1029_v54 }
 0x5fd   :  { %v1086_v61 = vadd.f32 %v1085_v47, %v1059_v55 }
 0x602   :  { %v1118_v1 = vpop.f32.mrf.mxu2 }
 0x603   :  { %v1119_v2 = vadd.f32 %v1118_v1, %v1086_v61  ;;  %v3364_v61 = vpop.f32.mrf.mxu1 }
 0x605   :  { %v1144_v44 = vadd.f32 %v1143_v3, %v1119_v2 }
 0x607   :  { %v1146_v10 = vadd.f32 %v1144_v44, %v653_v20  ;;  %v592_v44 = vadd.f32 %v3150_v0, %v3135_v32 }
 0x609   :  { %2622 = vtanh.f32 %v1146_v10  ;;  %v2586_v48 = vmul.f32 -1.442695, %v1146_v10 }
 0x60b   :  { %2624 = vpow2.f32 %v2586_v48 }
 0x60f   :  { %v2623_v59 = vpop.eup %2622 }
 0x610   :  { %1169 = vrot.lane.b32.xlu1 %v2623_v59, %s2706_s2 }
 0x611   :  { %v2625_v50 = vpop.eup %2624 }
 0x612   :  { %v1150_v51 = vadd.f32 1.0, %v2625_v50 }
 0x614   :  { %2626 = vrcp.f32 %v1150_v51  ;;  %v1162_v5 = vand.u32 2147483648, %v1150_v51  ;;  %vm1156_vm2 = vweird.f32 %v1150_v51  ;;  %v1160_v6 = vand.u32 2147483647, %v1150_v51 }
 0x616   :  { %v1163_v9 = vor.u32 1.1754944e-38, %v1162_v5  ;;  %vm1161_vm4 = vcmp.eq.f32.partialorder %v1160_v6, 8.507059e+37 }
 0x61a   :  { %v2627_v4 = vpop.eup %2626 }
 0x61b   :  { %v1152_v14 = vmul.f32 %v2627_v4, %v1150_v51  ;;  %vm1157_vm1 = vweird.f32 %v2627_v4  ;;  %v657_v51 = vadd.f32 %v3148_v62, %v592_v44 }
 0x61c   :  { %vm1158_vm3 = vmor %vm1156_vm2, %vm1157_vm1 }
 0x61d   :  { %v1153_v23 = vsub.f32 1.0, %v1152_v14 }
 0x61f   :  { %v1154_v57 = vmul.f32 %v2627_v4, %v1153_v23 }
 0x621   :  { %v1155_v19 = vadd.f32 %v2627_v4, %v1154_v57 }
 0x623   :  { %v1159_v15 = vsel %vm1158_vm3, %v2627_v4, %v1155_v19 }
 0x624   :  { %v1164_v18 = vsel %vm1161_vm4, %v1163_v9, %v1159_v15 }
 0x625   :  { %v1167_v27 = vmul.f32 %v1164_v18, %v3296_v17 }
 0x682   :  { %v1170_v16 = vpop.permute.xlu1 %1169 }
 0x683   :  { %v1172_v24 = vmul.f32 %v1170_v16, %v1164_v18 }
 0x685   :  { %1174 = vrot.lane.b32.xlu2 %v1172_v24, %s2707_s20 }
 0x6df   :  { %v1175_v29 = vpop.permute.xlu2 %1174 }
 0x6e0   :  { %v3332_v30 = vadd.f32 %v1175_v29, %v1167_v27 }
 0x6e2   :  { %2628 = vtanh.f32 %v3332_v30 }
 0x6e8   :  { %v2629_v31 = vpop.eup %2628 }
 0x6e9   :  { %1180 = vrot.lane.b32.xlu0 %v2629_v31, %s2706_s2 }
 0x75b   :  { %v1181_v34 = vpop.permute.xlu0 %1180 }
 0x75c   :  { %v1183_v60 = vmul.f32 %v1181_v34, %v1164_v18 }
 0x75e   :  { %1186 = vrot.lane.b32.xlu1 %v1183_v60, %s2707_s20 }
 0x7d0   :  { %v1187_v37 = vpop.permute.xlu1 %1186 }
 0x7d1   :  { %v1188_v40 = vsel %vm729_vm12, %v1187_v37, 0 }
 0x7d2   :  { %v1210_v45 = vand.u32 4294901760, %v1188_v40 }
 0x7d4   :  { %v1211_v46 = vsub.f32 %v1188_v40, %v1210_v45  ;;  %1256 = vmatmul.f32.vlgmr.msrb.gmra.mxu3 %v1210_v45  ;;  %1346 = vmatmul.f32.vlgmr.msra.gmra.mxu0 %v1210_v45 }
 0x7d5   :  { %1371 = vmatmul.f32.vlgmr.msra.gmra.mxu1 %v1210_v45  ;;  %1465 = vmatpush.msrb.mxu3 %v3224_v52 }
 0x7d6   :  { %v1212_v17 = vand.u32 4294901760, %v1211_v46  ;;  %1694 = vmatpush.msra.mxu1 %v3224_v52  ;;  %1661 = vmatpush.msra.mxu0 %v3176_v8 }
 0x7d7   :  { %1471 = vmatpush.msrb.mxu3 %v3226_v58 }
 0x7d8   :  { %v1213_v47 = vsub.f32 %v1211_v46, %v1212_v17  ;;  %1700 = vmatpush.msra.mxu1 %v3226_v58  ;;  %1663 = vmatpush.msra.mxu0 %v3178_v12 }
 0x7d9   :  { %1477 = vmatpush.msrb.mxu3 %v3235_v7 }
 0x7da   :  { %v1214_v53 = vand.u32 4294901760, %v1213_v47  ;;  %1706 = vmatpush.msra.mxu1 %v3235_v7  ;;  %1665 = vmatpush.msra.mxu0 %v3180_v13 }
 0x7db   :  { %1483 = vmatpush.msrb.mxu3 %v3241_v63 }
 0x7dc   :  { %1215 = vmatmul.f32.vlgmr.msrb.gmra.mxu2 %v1214_v53  ;;  %1313 = vmatmul.f32.vlgmr.msra.gmra.mxu3 %v1212_v17 }
 0x7dd   :  { %1432 = vmatpush.msrb.mxu2 %v3176_v8  ;;  %1592 = vmatpush.msra.mxu3 %v3176_v8 }
 0x7de   :  { %1712 = vmatpush.msra.mxu1 %v3241_v63  ;;  %1667 = vmatpush.msra.mxu0 %v3185_v21 }
 0x7df   :  { %1434 = vmatpush.msrb.mxu2 %v3178_v12  ;;  %1594 = vmatpush.msra.mxu3 %v3178_v12 }
 0x7e1   :  { %1436 = vmatpush.msrb.mxu2 %v3180_v13  ;;  %1596 = vmatpush.msra.mxu3 %v3180_v13 }
 0x7e3   :  { %1438 = vmatpush.msrb.mxu2 %v3185_v21  ;;  %1598 = vmatpush.msra.mxu3 %v3185_v21 }
 0x7e4   :  { %1286 = vmatmul.f32.vlgmr.msra.gmra.mxu2 %v1211_v46 }
 0x7e5   :  { %1561 = vmatpush.msra.mxu2 %v3202_v39 }
 0x7e7   :  { %1565 = vmatpush.msra.mxu2 %v3206_v41 }
 0x7e9   :  { %1569 = vmatpush.msra.mxu2 %v3209_v42 }
 0x7eb   :  { %1573 = vmatpush.msra.mxu2 %v3213_v43 }
 0x851   :  { %v1347_v59 = vpop.f32.mrf.mxu0 }
 0x852   :  { %v1372_v50 = vpop.f32.mrf.mxu1 }
 0x857   :  { %v1257_v54 = vpop.f32.mrf.mxu3 }
 0x85f   :  { %v1216_v55 = vpop.f32.mrf.mxu2  ;;  %v1314_v20 = vpop.f32.mrf.mxu3 }
 0x860   :  { %v1258_v1 = vadd.f32 %v1257_v54, %v1216_v55 }
 0x867   :  { %v1287_v2 = vpop.f32.mrf.mxu2 }
 0x868   :  { %v1288_v3 = vadd.f32 %v1287_v2, %v1258_v1 }
 0x86a   :  { %v1315_v10 = vadd.f32 %v1314_v20, %v1288_v3 }
 0x86c   :  { %v1348_v48 = vadd.f32 %v1347_v59, %v1315_v10 }
 0x86e   :  { %v1373_v4 = vadd.f32 %v1372_v50, %v1348_v48 }
 0x870   :  { %v1375_v14 = vadd.f32 %v1373_v4, %v657_v51 }
 0x872   :  { %2630 = vtanh.f32 %v1375_v14  ;;  %v2587_v57 = vmul.f32 -1.442695, %v1375_v14 }
 0x874   :  { %2632 = vpow2.f32 %v2587_v57 }
 0x878   :  { %v2631_v23 = vpop.eup %2630 }
 0x879   :  { %1398 = vrot.lane.b32.xlu2 %v2631_v23, %s2706_s2 }
 0x87a   :  { %v2633_v19 = vpop.eup %2632 }
 0x87b   :  { %v1379_v5 = vadd.f32 1.0, %v2633_v19 }
 0x87d   :  { %2634 = vrcp.f32 %v1379_v5  ;;  %v1391_v16 = vand.u32 2147483648, %v1379_v5  ;;  %vm1385_vm6 = vweird.f32 %v1379_v5  ;;  %v1389_v62 = vand.u32 2147483647, %v1379_v5 }
 0x87f   :  { %v1392_v24 = vor.u32 1.1754944e-38, %v1391_v16  ;;  %vm1390_vm8 = vcmp.eq.f32.partialorder %v1389_v62, 8.507059e+37 }
 0x883   :  { %v2635_v6 = vpop.eup %2634 }
 0x884   :  { %v1381_v15 = vmul.f32 %v2635_v6, %v1379_v5  ;;  %vm1386_vm5 = vweird.f32 %v2635_v6 }
 0x885   :  { %vm1387_vm7 = vmor %vm1385_vm6, %vm1386_vm5 }
 0x886   :  { %v1382_v32 = vsub.f32 1.0, %v1381_v15 }
 0x888   :  { %v1383_v0 = vmul.f32 %v2635_v6, %v1382_v32 }
 0x88a   :  { %v1384_v9 = vadd.f32 %v2635_v6, %v1383_v0 }
 0x88c   :  { %v1388_v18 = vsel %vm1387_vm7, %v2635_v6, %v1384_v9 }
 0x88d   :  { %v1393_v29 = vsel %vm1390_vm8, %v1392_v24, %v1388_v18 }
 0x88e   :  { %v1396_v34 = vmul.f32 %v1393_v29, %v3332_v30 }
 0x8d3   :  { %v1399_v27 = vpop.permute.xlu2 %1398 }
 0x8d4   :  { %v1401_v31 = vmul.f32 %v1399_v27, %v1393_v29 }
 0x8d6   :  { %1403 = vrot.lane.b32.xlu0 %v1401_v31, %s2707_s20 }
 0x948   :  { %v1404_v60 = vpop.permute.xlu0 %1403 }
 0x949   :  { %v3372_v37 = vadd.f32 %v1404_v60, %v1396_v34 }
 0x94b   :  { %2636 = vtanh.f32 %v3372_v37 }
 0x951   :  { %v2637_v40 = vpop.eup %2636 }
 0x952   :  { %1409 = vrot.lane.b32.xlu1 %v2637_v40, %s2706_s2 }
 0x9c4   :  { %v1410_v45 = vpop.permute.xlu1 %1409 }
 0x9c5   :  { %v1412_v46 = vmul.f32 %v1410_v45, %v1393_v29 }
 0x9c7   :  { %1415 = vrot.lane.b32.xlu2 %v1412_v46, %s2707_s20 }
 0xa21   :  { %v1416_v17 = vpop.permute.xlu2 %1415 }
 0xa22   :  { %v1417_v47 = vsel %vm729_vm12, %v1416_v17, 0 }
 0xa23   :  { %v1439_v53 = vand.u32 4294901760, %v1417_v47 }
 0xa25   :  { %v1440_v54 = vsub.f32 %v1417_v47, %v1439_v53  ;;  %1485 = vmatmul.f32.vlgmr.msrb.gmra.mxu3 %v1439_v53 }
 0xa26   :  { %1761 = vmatpush.msrb.mxu3 %v3176_v8 }
 0xa27   :  { %v1441_v30 = vand.u32 4294901760, %v1440_v54  ;;  %1515 = vmatmul.f32.vlgmr.msrb.gmra.mxu0 %v1440_v54 }
 0xa28   :  { %1763 = vmatpush.msrb.mxu3 %v3178_v12  ;;  %1790 = vmatpush.msrb.mxu0 %v3202_v39 }
 0xa29   :  { %v1442_v55 = vsub.f32 %v1440_v54, %v1441_v30  ;;  %1542 = vmatmul.f32.vlgmr.msrb.gmra.mxu1 %v1441_v30 }
 0xa2a   :  { %1765 = vmatpush.msrb.mxu3 %v3180_v13  ;;  %1821 = vmatpush.msrb.mxu1 %v3176_v8 }
 0xa2b   :  { %v1443_v1 = vand.u32 4294901760, %v1442_v55  ;;  %1794 = vmatpush.msrb.mxu0 %v3206_v41 }
 0xa2c   :  { %1767 = vmatpush.msrb.mxu3 %v3185_v21  ;;  %1823 = vmatpush.msrb.mxu1 %v3178_v12 }
 0xa2d   :  { %1444 = vmatmul.f32.vlgmr.msrb.gmra.mxu2 %v1443_v1  ;;  %1600 = vmatmul.f32.vlgmr.msra.gmra.mxu3 %v1439_v53 }
 0xa2e   :  { %1732 = vmatpush.msrb.mxu2 %v3189_v28  ;;  %1825 = vmatpush.msrb.mxu1 %v3180_v13 }
 0xa2f   :  { %1798 = vmatpush.msrb.mxu0 %v3209_v42  ;;  %1923 = vmatpush.msra.mxu3 %v3224_v52 }
 0xa30   :  { %1735 = vmatpush.msrb.mxu2 %v3192_v35  ;;  %1827 = vmatpush.msrb.mxu1 %v3185_v21 }
 0xa31   :  { %1802 = vmatpush.msrb.mxu0 %v3213_v43  ;;  %1929 = vmatpush.msra.mxu3 %v3226_v58 }
 0xa32   :  { %1738 = vmatpush.msrb.mxu2 %v3195_v36 }
 0xa33   :  { %1935 = vmatpush.msra.mxu3 %v3235_v7 }
 0xa34   :  { %1741 = vmatpush.msrb.mxu2 %v3199_v38 }
 0xa35   :  { %1575 = vmatmul.f32.vlgmr.msra.gmra.mxu2 %v1439_v53  ;;  %1941 = vmatpush.msra.mxu3 %v3241_v63 }
 0xa36   :  { %1890 = vmatpush.msra.mxu2 %v3176_v8 }
 0xa38   :  { %1892 = vmatpush.msra.mxu2 %v3178_v12 }
 0xa3a   :  { %1894 = vmatpush.msra.mxu2 %v3180_v13 }
 0xa3c   :  { %1896 = vmatpush.msra.mxu2 %v3185_v21 }
 0xaa4   :  { %v1516_v44 = vpop.f32.mrf.mxu0 }
 0xaa6   :  { %v1543_v59 = vpop.f32.mrf.mxu1 }
 0xaa8   :  { %v1486_v2 = vpop.f32.mrf.mxu3 }
 0xab0   :  { %v1445_v3 = vpop.f32.mrf.mxu2  ;;  %v1601_v4 = vpop.f32.mrf.mxu3 }
 0xab1   :  { %v1487_v20 = vadd.f32 %v1486_v2, %v1445_v3 }
 0xab3   :  { %v1517_v10 = vadd.f32 %v1516_v44, %v1487_v20 }
 0xab5   :  { %v1544_v48 = vadd.f32 %v1543_v59, %v1517_v10 }
 0xab8   :  { %v1576_v50 = vpop.f32.mrf.mxu2 }
 0xab9   :  { %v1577_v51 = vadd.f32 %v1576_v50, %v1544_v48 }
 0xabb   :  { %v1602_v14 = vadd.f32 %v1601_v4, %v1577_v51 }
 0xabd   :  { %v1604_v23 = vadd.f32 %v1602_v14, %v3152_v33 }
 0xabf   :  { %2638 = vtanh.f32 %v1604_v23  ;;  %v2588_v19 = vmul.f32 -1.442695, %v1604_v23 }
 0xac1   :  { %2640 = vpow2.f32 %v2588_v19 }
 0xac5   :  { %v2639_v57 = vpop.eup %2638 }
 0xac6   :  { %1627 = vrot.lane.b32.xlu0 %v2639_v57, %s2706_s2 }
 0xac7   :  { %v2641_v5 = vpop.eup %2640 }
 0xac8   :  { %v1608_v6 = vadd.f32 1.0, %v2641_v5 }
 0xaca   :  { %2642 = vrcp.f32 %v1608_v6  ;;  %v1620_v62 = vand.u32 2147483648, %v1608_v6  ;;  %vm1614_vm10 = vweird.f32 %v1608_v6  ;;  %v1618_v18 = vand.u32 2147483647, %v1608_v6 }
 0xacc   :  { %v1621_v24 = vor.u32 1.1754944e-38, %v1620_v62  ;;  %vm1619_vm13 = vcmp.eq.f32.partialorder %v1618_v18, 8.507059e+37 }
 0xad0   :  { %v2643_v15 = vpop.eup %2642 }
 0xad1   :  { %v1610_v32 = vmul.f32 %v2643_v15, %v1608_v6  ;;  %vm1615_vm9 = vweird.f32 %v2643_v15 }
 0xad2   :  { %vm1616_vm11 = vmor %vm1614_vm10, %vm1615_vm9 }
 0xad3   :  { %v1611_v0 = vsub.f32 1.0, %v1610_v32 }
 0xad5   :  { %v1612_v9 = vmul.f32 %v2643_v15, %v1611_v0 }
 0xad7   :  { %v1613_v16 = vadd.f32 %v2643_v15, %v1612_v9 }
 0xad9   :  { %v1617_v33 = vsel %vm1616_vm11, %v2643_v15, %v1613_v16 }
 0xada   :  { %v1622_v29 = vsel %vm1619_vm13, %v1621_v24, %v1617_v33 }
 0xadb   :  { %v1625_v34 = vmul.f32 %v1622_v29, %v3372_v37 }
 0xb38   :  { %v1628_v27 = vpop.permute.xlu0 %1627 }
 0xb39   :  { %v1630_v31 = vmul.f32 %v1628_v27, %v1622_v29 }
 0xb3b   :  { %1632 = vrot.lane.b32.xlu1 %v1630_v31, %s2707_s20 }
 0xbad   :  { %v1633_v60 = vpop.permute.xlu1 %1632 }
 0xbae   :  { %v3406_v40 = vadd.f32 %v1633_v60, %v1625_v34 }
 0xbb0   :  { %2644 = vtanh.f32 %v3406_v40 }
 0xbb6   :  { %v2645_v45 = vpop.eup %2644 }
 0xbb7   :  { %1638 = vrot.lane.b32.xlu2 %v2645_v45, %s2706_s2 }
 0xc11   :  { %v1639_v46 = vpop.permute.xlu2 %1638 }
 0xc12   :  { %v1641_v17 = vmul.f32 %v1639_v46, %v1622_v29 }
 0xc14   :  { %1644 = vrot.lane.b32.xlu0 %v1641_v17, %s2707_s20 }
 0xc86   :  { %v1645_v47 = vpop.permute.xlu0 %1644 }
 0xc87   :  { %v1646_v53 = vsel %vm729_vm12, %v1645_v47, 0 }
 0xc88   :  { %v1668_v54 = vand.u32 4294901760, %v1646_v53 }
 0xc8a   :  { %v1669_v30 = vsub.f32 %v1646_v53, %v1668_v54  ;;  %1714 = vmatmul.f32.vlgmr.msra.gmra.mxu1 %v1668_v54 }
 0xc8b   :  { %1990 = vmatpush.msra.mxu1 %v3176_v8 }
 0xc8c   :  { %v1670_v37 = vand.u32 4294901760, %v1669_v30  ;;  %1744 = vmatmul.f32.vlgmr.msrb.gmra.mxu2 %v1669_v30 }
 0xc8d   :  { %1992 = vmatpush.msra.mxu1 %v3178_v12  ;;  %2019 = vmatpush.msrb.mxu2 %v3202_v39 }
 0xc8e   :  { %v1671_v55 = vsub.f32 %v1669_v30, %v1670_v37  ;;  %1771 = vmatmul.f32.vlgmr.msrb.gmra.mxu3 %v1670_v37 }
 0xc8f   :  { %1994 = vmatpush.msra.mxu1 %v3180_v13  ;;  %2050 = vmatpush.msrb.mxu3 %v3176_v8 }
 0xc90   :  { %v1672_v1 = vand.u32 4294901760, %v1671_v55  ;;  %2023 = vmatpush.msrb.mxu2 %v3206_v41 }
 0xc91   :  { %1996 = vmatpush.msra.mxu1 %v3185_v21  ;;  %2052 = vmatpush.msrb.mxu3 %v3178_v12 }
 0xc92   :  { %1673 = vmatmul.f32.vlgmr.msra.gmra.mxu0 %v1672_v1  ;;  %1829 = vmatmul.f32.vlgmr.msrb.gmra.mxu1 %v1668_v54 }
 0xc93   :  { %1961 = vmatpush.msra.mxu0 %v3189_v28  ;;  %2054 = vmatpush.msrb.mxu3 %v3180_v13 }
 0xc94   :  { %2027 = vmatpush.msrb.mxu2 %v3209_v42  ;;  %2152 = vmatpush.msrb.mxu1 %v3224_v52 }
 0xc95   :  { %1964 = vmatpush.msra.mxu0 %v3192_v35  ;;  %2056 = vmatpush.msrb.mxu3 %v3185_v21 }
 0xc96   :  { %2031 = vmatpush.msrb.mxu2 %v3213_v43  ;;  %2158 = vmatpush.msrb.mxu1 %v3226_v58 }
 0xc97   :  { %1967 = vmatpush.msra.mxu0 %v3195_v36 }
 0xc98   :  { %2164 = vmatpush.msrb.mxu1 %v3235_v7 }
 0xc99   :  { %1970 = vmatpush.msra.mxu0 %v3199_v38 }
 0xc9a   :  { %1804 = vmatmul.f32.vlgmr.msrb.gmra.mxu0 %v1668_v54  ;;  %2170 = vmatpush.msrb.mxu1 %v3241_v63 }
 0xc9b   :  { %2119 = vmatpush.msrb.mxu0 %v3176_v8 }
 0xc9d   :  { %2121 = vmatpush.msrb.mxu0 %v3178_v12 }
 0xc9f   :  { %2123 = vmatpush.msrb.mxu0 %v3180_v13 }
 0xca1   :  { %2125 = vmatpush.msrb.mxu0 %v3185_v21 }
 0xd07   :  { %v1715_v52 = vpop.f32.mrf.mxu1 }
 0xd0f   :  { %v1674_v2 = vpop.f32.mrf.mxu0  ;;  %v1745_v3 = vpop.f32.mrf.mxu2 }
 0xd10   :  { %v1716_v58 = vadd.f32 %v1715_v52, %v1674_v2  ;;  %v1830_v48 = vpop.f32.mrf.mxu1 }
 0xd11   :  { %v1772_v44 = vpop.f32.mrf.mxu3 }
 0xd12   :  { %v1746_v20 = vadd.f32 %v1745_v3, %v1716_v58 }
 0xd14   :  { %v1773_v7 = vadd.f32 %v1772_v44, %v1746_v20 }
 0xd17   :  { %v1805_v10 = vpop.f32.mrf.mxu0 }
 0xd18   :  { %v1806_v59 = vadd.f32 %v1805_v10, %v1773_v7 }
 0xd1a   :  { %v1831_v50 = vadd.f32 %v1830_v48, %v1806_v59 }
 0xd1c   :  { %v1833_v63 = vadd.f32 %v1831_v50, %v3154_v11 }
 0xd1e   :  { %2646 = vtanh.f32 %v1833_v63  ;;  %v2589_v4 = vmul.f32 -1.442695, %v1833_v63 }
 0xd20   :  { %2648 = vpow2.f32 %v2589_v4 }
 0xd24   :  { %v2647_v51 = vpop.eup %2646 }
 0xd25   :  { %1856 = vrot.lane.b32.xlu1 %v2647_v51, %s2706_s2 }
 0xd26   :  { %v2649_v14 = vpop.eup %2648 }
 0xd27   :  { %v1837_v23 = vadd.f32 1.0, %v2649_v14 }
 0xd29   :  { %2650 = vrcp.f32 %v1837_v23  ;;  %v1849_v32 = vand.u32 2147483648, %v1837_v23  ;;  %vm1843_vm15 = vweird.f32 %v1837_v23  ;;  %v1847_v0 = vand.u32 2147483647, %v1837_v23 }
 0xd2b   :  { %v1850_v9 = vor.u32 1.1754944e-38, %v1849_v32  ;;  %vm1848_vm1 = vcmp.eq.f32.partialorder %v1847_v0, 8.507059e+37 }
 0xd2f   :  { %v2651_v57 = vpop.eup %2650 }
 0xd30   :  { %v1839_v19 = vmul.f32 %v2651_v57, %v1837_v23  ;;  %vm1844_vm14 = vweird.f32 %v2651_v57 }
 0xd31   :  { %vm1845_vm0 = vmor %vm1843_vm15, %vm1844_vm14 }
 0xd32   :  { %v1840_v5 = vsub.f32 1.0, %v1839_v19 }
 0xd34   :  { %v1841_v6 = vmul.f32 %v2651_v57, %v1840_v5 }
 0xd36   :  { %v1842_v15 = vadd.f32 %v2651_v57, %v1841_v6 }
 0xd38   :  { %v1846_v11 = vsel %vm1845_vm0, %v2651_v57, %v1842_v15 }
 0xd39   :  { %v1851_v62 = vsel %vm1848_vm1, %v1850_v9, %v1846_v11 }
 0xd3a   :  { %v1854_v33 = vmul.f32 %v1851_v62, %v3406_v40 }
 0xd97   :  { %v1857_v16 = vpop.permute.xlu1 %1856 }
 0xd98   :  { %v1859_v18 = vmul.f32 %v1857_v16, %v1851_v62  ;;  %v430_v16 = vadd.f32 %v3288_v26, %v3137_v49 }
 0xd9a   :  { %1861 = vrot.lane.b32.xlu2 %v1859_v18, %s2707_s20 }
 0xdf4   :  { %v1862_v24 = vpop.permute.xlu2 %1861 }
 0xdf5   :  { %v3440_v27 = vadd.f32 %v1862_v24, %v1854_v33  ;;  %v511_v24 = vadd.f32 %v3286_v25, %v430_v16 }
 0xdf7   :  { %2652 = vtanh.f32 %v3440_v27 }
 0xdfd   :  { %v2653_v29 = vpop.eup %2652 }
 0xdfe   :  { %1867 = vrot.lane.b32.xlu0 %v2653_v29, %s2706_s2  ;;  %v608_v29 = vadd.f32 %v3362_v56, %v511_v24 }
 0xe70   :  { %v1868_v31 = vpop.permute.xlu0 %1867 }
 0xe71   :  { %v1870_v34 = vmul.f32 %v1868_v31, %v1851_v62 }
 0xe73   :  { %1873 = vrot.lane.b32.xlu1 %v1870_v34, %s2707_s20 }
 0xee5   :  { %v1874_v60 = vpop.permute.xlu1 %1873 }
 0xee6   :  { %v1875_v45 = vsel %vm729_vm12, %v1874_v60, 0 }
 0xee7   :  { %v1897_v46 = vand.u32 4294901760, %v1875_v45 }
 0xee9   :  { %v1898_v17 = vsub.f32 %v1875_v45, %v1897_v46  ;;  %1943 = vmatmul.f32.vlgmr.msra.gmra.mxu3 %v1897_v46 }
 0xeea   :  { %2219 = vmatpush.msra.mxu3 %v3176_v8 }
 0xeeb   :  { %v1899_v40 = vand.u32 4294901760, %v1898_v17  ;;  %1973 = vmatmul.f32.vlgmr.msra.gmra.mxu0 %v1898_v17 }
 0xeec   :  { %2221 = vmatpush.msra.mxu3 %v3178_v12  ;;  %2248 = vmatpush.msra.mxu0 %v3202_v39 }
 0xeed   :  { %v1900_v47 = vsub.f32 %v1898_v17, %v1899_v40  ;;  %2000 = vmatmul.f32.vlgmr.msra.gmra.mxu1 %v1899_v40 }
 0xeee   :  { %2223 = vmatpush.msra.mxu3 %v3180_v13  ;;  %2279 = vmatpush.msra.mxu1 %v3176_v8 }
 0xeef   :  { %v1901_v53 = vand.u32 4294901760, %v1900_v47  ;;  %2252 = vmatpush.msra.mxu0 %v3206_v41 }
 0xef0   :  { %2225 = vmatpush.msra.mxu3 %v3185_v21  ;;  %2281 = vmatpush.msra.mxu1 %v3178_v12 }
 0xef1   :  { %1902 = vmatmul.f32.vlgmr.msra.gmra.mxu2 %v1901_v53  ;;  %2058 = vmatmul.f32.vlgmr.msrb.gmra.mxu3 %v1897_v46 }
 0xef2   :  { %2190 = vmatpush.msra.mxu2 %v3189_v28  ;;  %2283 = vmatpush.msra.mxu1 %v3180_v13 }
 0xef3   :  { %2256 = vmatpush.msra.mxu0 %v3209_v42 }
 0xef4   :  { %2193 = vmatpush.msra.mxu2 %v3192_v35  ;;  %2285 = vmatpush.msra.mxu1 %v3185_v21 }
 0xef5   :  { %2260 = vmatpush.msra.mxu0 %v3213_v43 }
 0xef6   :  { %2196 = vmatpush.msra.mxu2 %v3195_v36 }
 0xef8   :  { %2199 = vmatpush.msra.mxu2 %v3199_v38 }
 0xef9   :  { %2033 = vmatmul.f32.vlgmr.msrb.gmra.mxu2 %v1897_v46  ;;  %v673_v46 = vadd.f32 %v3364_v61, %v608_v29 }
 0xf68   :  { %v1974_v41 = vpop.f32.mrf.mxu0 }
 0xf6a   :  { %v2001_v54 = vpop.f32.mrf.mxu1 }
 0xf6c   :  { %v1944_v8 = vpop.f32.mrf.mxu3 }
 0xf74   :  { %v1903_v12 = vpop.f32.mrf.mxu2  ;;  %v2059_v37 = vpop.f32.mrf.mxu3 }
 0xf75   :  { %v1945_v39 = vadd.f32 %v1944_v8, %v1903_v12 }
 0xf77   :  { %v1975_v28 = vadd.f32 %v1974_v41, %v1945_v39 }
 0xf79   :  { %v2002_v13 = vadd.f32 %v2001_v54, %v1975_v28 }
 0xf7c   :  { %v2034_v30 = vpop.f32.mrf.mxu2 }
 0xf7d   :  { %v2035_v42 = vadd.f32 %v2034_v30, %v2002_v13 }
 0xf7f   :  { %v2060_v35 = vadd.f32 %v2059_v37, %v2035_v42 }
 0xf81   :  { %v2062_v21 = vadd.f32 %v2060_v35, %v3156_v22 }
 0xf83   :  { %2654 = vtanh.f32 %v2062_v21  ;;  %v2590_v36 = vmul.f32 -1.442695, %v2062_v21 }
 0xf85   :  { %2656 = vpow2.f32 %v2590_v36  ;;  %v2332_v36 = vld [vmem:[%s3501_s4 + $0x18] sm:$0xff] }
 0xf89   :  { %v2655_v43 = vpop.eup %2654 }
 0xf8a   :  { %2085 = vrot.lane.b32.xlu2 %v2655_v43, %s2706_s2 }
 0xf8b   :  { %v2657_v38 = vpop.eup %2656 }
 0xf8c   :  { %v2066_v55 = vadd.f32 1.0, %v2657_v38  ;;  %v2331_v38 = vld [vmem:[%s3501_s4 + $0x10] sm:$0xff] }
 0xf8e   :  { %2658 = vrcp.f32 %v2066_v55  ;;  %v2078_v20 = vand.u32 2147483648, %v2066_v55  ;;  %vm2072_vm3 = vweird.f32 %v2066_v55  ;;  %v2076_v44 = vand.u32 2147483647, %v2066_v55 }
 0xf90   :  { %v2079_v7 = vor.u32 1.1754944e-38, %v2078_v20  ;;  %vm2077_vm5 = vcmp.eq.f32.partialorder %v2076_v44, 8.507059e+37 }
 0xf94   :  { %v2659_v1 = vpop.eup %2658 }
 0xf95   :  { %v2068_v52 = vmul.f32 %v2659_v1, %v2066_v55  ;;  %vm2073_vm2 = vweird.f32 %v2659_v1  ;;  %v2354_v55 = vand.u32 4294901760, %v2332_v36 }
 0xf96   :  { %vm2074_vm4 = vmor %vm2072_vm3, %vm2073_vm2 }
 0xf97   :  { %v2069_v2 = vsub.f32 1.0, %v2068_v52  ;;  %v2384_v52 = vsub.f32 %v2332_v36, %v2354_v55  ;;  %2355 = vmatpush.msrb.mxu2 %v2354_v55 }
 0xf99   :  { %v2070_v58 = vmul.f32 %v2659_v1, %v2069_v2 }
 0xf9b   :  { %v2071_v3 = vadd.f32 %v2659_v1, %v2070_v58  ;;  %v2385_v58 = vand.u32 4294901760, %v2384_v52 }
 0xf9d   :  { %v2075_v22 = vsel %vm2074_vm4, %v2659_v1, %v2071_v3  ;;  %v2356_v1 = vand.u32 4294901760, %v2331_v38  ;;  %v2386_v20 = vsub.f32 %v2384_v52, %v2385_v58 }
 0xf9e   :  { %v2080_v59 = vsel %vm2077_vm5, %v2079_v7, %v2075_v22 }
 0xf9f   :  { %v2083_v50 = vmul.f32 %v2080_v59, %v3440_v27  ;;  %v2390_v2 = vsub.f32 %v2331_v38, %v2356_v1  ;;  %2357 = vmatpush.msrb.mxu2 %v2356_v1  ;;  %v2387_v22 = vand.u32 4294901760, %v2386_v20 }
 0xfa1   :  { %v2391_v3 = vand.u32 4294901760, %v2390_v2  ;;  %2388 = vmatpush.msrb.mxu3 %v2387_v22 }
 0xfa3   :  { %v2392_v44 = vsub.f32 %v2390_v2, %v2391_v3 }
 0xfa5   :  { %v2393_v7 = vand.u32 4294901760, %v2392_v44 }
 0xfa7   :  { %2394 = vmatpush.msrb.mxu3 %v2393_v7 }
 0xfe4   :  { %v2086_v10 = vpop.permute.xlu2 %2085 }
 0xfe5   :  { %v2088_v48 = vmul.f32 %v2086_v10, %v2080_v59 }
 0xfe7   :  { %2090 = vrot.lane.b32.xlu0 %v2088_v48, %s2707_s20  ;;  %v2330_v48 = vld [vmem:[%s3501_s4 + $0x8] sm:$0xff] }
0x1059   :  { %v2091_v63 = vpop.permute.xlu0 %2090 }
0x105a   :  { %v2093_v51 = vadd.f32 %v2091_v63, %v2083_v50  ;;  %v2358_v50 = vand.u32 4294901760, %v2330_v48  ;;  %v2329_v63 = vld [vmem:[%s3501_s4] sm:$0xff] }
0x105c   :  { %2660 = vtanh.f32 %v2093_v51  ;;  %2359 = vmatpush.msrb.mxu2 %v2358_v50 }
0x1062   :  { %v2661_v4 = vpop.eup %2660 }
0x1063   :  { %2096 = vrot.lane.b32.xlu1 %v2661_v4, %s2706_s2  ;;  %v2360_v4 = vand.u32 4294901760, %v2329_v63 }
0x1065   :  { %2361 = vmatpush.msrb.mxu2 %v2360_v4 }
0x10d5   :  { %v2097_v14 = vpop.permute.xlu1 %2096 }
0x10d6   :  { %v2099_v23 = vmul.f32 %v2097_v14, %v2080_v59 }
0x10d8   :  { %2102 = vrot.lane.b32.xlu2 %v2099_v23, %s2707_s20  ;;  %v2402_v23 = vsub.f32 %v2329_v63, %v2360_v4 }
0x1132   :  { %v2103_v57 = vpop.permute.xlu2 %2102 }
0x1133   :  { %v2104_v19 = vsel %vm729_vm12, %v2103_v57, 0 }
0x1134   :  { %v2126_v5 = vand.u32 4294901760, %v2104_v19 }
0x1136   :  { %v2127_v6 = vsub.f32 %v2104_v19, %v2126_v5  ;;  %2172 = vmatmul.f32.vlgmr.msrb.gmra.mxu1 %v2126_v5  ;;  %v2403_v19 = vand.u32 4294901760, %v2402_v23 }
0x1137   :  { %2455 = vmatpush.msrb.mxu1 %v2354_v55 }
0x1138   :  { %v2128_v15 = vand.u32 4294901760, %v2127_v6  ;;  %2202 = vmatmul.f32.vlgmr.msra.gmra.mxu2 %v2127_v6 }
0x1139   :  { %2457 = vmatpush.msrb.mxu1 %v2356_v1  ;;  %2484 = vmatpush.msra.mxu2 %v2385_v58 }
0x113a   :  { %v2129_v32 = vsub.f32 %v2127_v6, %v2128_v15  ;;  %2229 = vmatmul.f32.vlgmr.msra.gmra.mxu3 %v2128_v15  ;;  %v2404_v6 = vsub.f32 %v2402_v23, %v2403_v19 }
0x113b   :  { %2459 = vmatpush.msrb.mxu1 %v2358_v50  ;;  %2488 = vmatpush.msra.mxu2 %v2391_v3 }
0x113c   :  { %v2130_v0 = vand.u32 4294901760, %v2129_v32  ;;  %v2405_v15 = vand.u32 4294901760, %v2404_v6 }
0x113d   :  { %2461 = vmatpush.msrb.mxu1 %v2360_v4 }
0x113e   :  { %2131 = vmatmul.f32.vlgmr.msrb.gmra.mxu0 %v2130_v0  ;;  %2287 = vmatmul.f32.vlgmr.msra.gmra.mxu1 %v2126_v5 }
0x113f   :  { %2426 = vmatpush.msrb.mxu0 %v2384_v52 }
0x1141   :  { %2429 = vmatpush.msrb.mxu0 %v2390_v2 }
0x1146   :  { %2262 = vmatmul.f32.vlgmr.msra.gmra.mxu0 %v2126_v5 }
0x11b3   :  { %v2173_v11 = vpop.f32.mrf.mxu1 }
0x11bb   :  { %v2132_v9 = vpop.f32.mrf.mxu0  ;;  %v2203_v18 = vpop.f32.mrf.mxu2 }
0x11bc   :  { %v2174_v62 = vadd.f32 %v2173_v11, %v2132_v9  ;;  %v2288_v45 = vpop.f32.mrf.mxu1 }
0x11bd   :  { %v2230_v27 = vpop.f32.mrf.mxu3 }
0x11be   :  { %v2204_v33 = vadd.f32 %v2203_v18, %v2174_v62 }
0x11c0   :  { %v2231_v31 = vadd.f32 %v2230_v27, %v2204_v33  ;;  %v2605_v33 = vld [vmem:[%s3502_s5] ss:$0 sm:$0xff] }
0x11c3   :  { %v2263_v34 = vpop.f32.mrf.mxu0 }
0x11c4   :  { %v2264_v60 = vadd.f32 %v2263_v34, %v2231_v31 }
0x11c6   :  { %v2289_v17 = vadd.f32 %v2288_v45, %v2264_v60 }
0x11c8   :  { %v2291_v40 = vadd.f32 %v2289_v17, %v673_v46 }
0x11ca   :  { %2662 = vtanh.f32 %v2291_v40  ;;  %v2591_v49 = vmul.f32 -1.442695, %v2291_v40 }
0x11cc   :  { %2664 = vpow2.f32 %v2591_v49 }
0x11d0   :  { %v2663_v47 = vpop.eup %2662 }
0x11d1   :  { %2314 = vrot.lane.b32.xlu0 %v2663_v47, %s2706_s2 }
0x11d2   :  { %v2665_v26 = vpop.eup %2664 }
0x11d3   :  { %v2295_v53 = vadd.f32 1.0, %v2665_v26 }
0x11d5   :  { %2666 = vrcp.f32 %v2295_v53  ;;  %v2307_v41 = vand.u32 2147483648, %v2295_v53  ;;  %vm2301_vm7 = vweird.f32 %v2295_v53  ;;  %v2305_v61 = vand.u32 2147483647, %v2295_v53 }
0x11d7   :  { %v2308_v54 = vor.u32 1.1754944e-38, %v2307_v41  ;;  %vm2306_vm9 = vcmp.eq.f32.partialorder %v2305_v61, 8.507059e+37 }
0x11db   :  { %v2667_v25 = vpop.eup %2666 }
0x11dc   :  { %v2297_v8 = vmul.f32 %v2667_v25, %v2295_v53  ;;  %vm2302_vm6 = vweird.f32 %v2667_v25 }
0x11dd   :  { %vm2303_vm8 = vmor %vm2301_vm7, %vm2302_vm6 }
0x11de   :  { %v2298_v56 = vsub.f32 1.0, %v2297_v8 }
0x11e0   :  { %v2299_v12 = vmul.f32 %v2667_v25, %v2298_v56 }
0x11e2   :  { %v2300_v39 = vadd.f32 %v2667_v25, %v2299_v12 }
0x11e4   :  { %v2304_v28 = vsel %vm2303_vm8, %v2667_v25, %v2300_v39 }
0x11e5   :  { %v2309_v30 = vsel %vm2306_vm9, %v2308_v54, %v2304_v28 }
0x11e6   :  { %v2312_v37 = vmul.f32 %v2309_v30, %v2093_v51  ;;  %v2396_v51 = vsub.f32 %v2330_v48, %v2358_v50 }
0x11e8   :  { %v2397_v14 = vand.u32 4294901760, %v2396_v51  ;;  %2432 = vmatpush.msrb.mxu0 %v2396_v51 }
0x11ea   :  { %v2398_v57 = vsub.f32 %v2396_v51, %v2397_v14  ;;  %2435 = vmatpush.msrb.mxu0 %v2402_v23  ;;  %2492 = vmatpush.msra.mxu2 %v2397_v14 }
0x11ec   :  { %v2399_v5 = vand.u32 4294901760, %v2398_v57  ;;  %2496 = vmatpush.msra.mxu2 %v2403_v19 }
0x11ee   :  { %2400 = vmatpush.msrb.mxu3 %v2399_v5 }
0x11f0   :  { %2406 = vmatpush.msrb.mxu3 %v2405_v15 }
0x11f2   :  { %2515 = vmatpush.msra.mxu3 %v2354_v55 }
0x11f4   :  { %2517 = vmatpush.msra.mxu3 %v2356_v1 }
0x11f6   :  { %2519 = vmatpush.msra.mxu3 %v2358_v50 }
0x11f8   :  { %2521 = vmatpush.msra.mxu3 %v2360_v4 }
0x1243   :  { %v2315_v13 = vpop.permute.xlu0 %2314 }
0x1244   :  { %v2317_v42 = vmul.f32 %v2315_v13, %v2309_v30 }
0x1246   :  { %2319 = vrot.lane.b32.xlu1 %v2317_v42, %s2707_s20 }
0x12b8   :  { %v2320_v35 = vpop.permute.xlu1 %2319 }
0x12b9   :  { %v2322_v21 = vadd.f32 %v2320_v35, %v2312_v37 }
0x12bb   :  { %2668 = vtanh.f32 %v2322_v21 }
0x12c1   :  { %v2669_v43 = vpop.eup %2668 }
0x12c2   :  { %2325 = vrot.lane.b32.xlu2 %v2669_v43, %s2706_s2 }
0x131c   :  { %v2326_v10 = vpop.permute.xlu2 %2325 }
0x131d   :  { %v2328_v59 = vmul.f32 %v2326_v10, %v2309_v30 }
0x131f   :  { %2338 = vrot.lane.b32.xlu0 %v2328_v59, %s2707_s20 }
0x1391   :  { %v2339_v32 = vpop.permute.xlu0 %2338 }
0x1392   :  { %v2340_v0 = vsel %vm729_vm12, %v2339_v32, 0 }
0x1393   :  { %v2362_v11 = vand.u32 4294901760, %v2340_v0 }
0x1395   :  { %v2363_v9 = vsub.f32 %v2340_v0, %v2362_v11  ;;  %2408 = vmatmul.f32.vlgmr.msrb.gmra.mxu3 %v2362_v11 }
0x1397   :  { %v2364_v16 = vand.u32 4294901760, %v2363_v9  ;;  %2438 = vmatmul.f32.vlgmr.msrb.gmra.mxu0 %v2363_v9 }
0x1399   :  { %v2365_v62 = vsub.f32 %v2363_v9, %v2364_v16  ;;  %2465 = vmatmul.f32.vlgmr.msrb.gmra.mxu1 %v2364_v16 }
0x139b   :  { %v2366_v18 = vand.u32 4294901760, %v2365_v62 }
0x139d   :  { %2367 = vmatmul.f32.vlgmr.msrb.gmra.mxu2 %v2366_v18  ;;  %2523 = vmatmul.f32.vlgmr.msra.gmra.mxu3 %v2362_v11 }
0x13a5   :  { %2498 = vmatmul.f32.vlgmr.msra.gmra.mxu2 %v2362_v11 }
0x1414   :  { %v2439_v34 = vpop.f32.mrf.mxu0 }
0x1416   :  { %v2466_v45 = vpop.f32.mrf.mxu1 }
0x1418   :  { %v2409_v24 = vpop.f32.mrf.mxu3 }
0x1420   :  { %v2368_v27 = vpop.f32.mrf.mxu2  ;;  %v2524_v47 = vpop.f32.mrf.mxu3 }
0x1421   :  { %v2369_v29 = vadd.f32 %v2605_v33, %v2368_v27 }
0x1423   :  { %v2410_v31 = vadd.f32 %v2409_v24, %v2369_v29 }
0x1425   :  { %v2440_v60 = vadd.f32 %v2439_v34, %v2410_v31 }
0x1427   :  { %v2467_v46 = vadd.f32 %v2466_v45, %v2440_v60 }
0x1428   :  { %v2499_v17 = vpop.f32.mrf.mxu2 }
0x1429   :  { %v2500_v40 = vadd.f32 %v2499_v17, %v2467_v46 }
0x142b   :  { %v2525_v49 = vadd.f32 %v2524_v47, %v2500_v40 }
0x142d   :  { %v2592_v26 = vmul.f32 -1.442695, %v2525_v49 }
0x142f   :  { %2670 = vpow2.f32 %v2592_v26 }
0x1435   :  { %v2671_v53 = vpop.eup %2670 }
0x1436   :  { %v2530_v25 = vadd.f32 1.0, %v2671_v53 }
0x1438   :  { %2672 = vrcp.f32 %v2530_v25  ;;  %v2542_v39 = vand.u32 2147483648, %v2530_v25  ;;  %v2540_v61 = vand.u32 2147483647, %v2530_v25  ;;  %vm2536_vm10 = vweird.f32 %v2530_v25 }
0x143a   :  { %v2543_v54 = vor.u32 1.1754944e-38, %v2542_v39  ;;  %vm2541_vm13 = vcmp.eq.f32.partialorder %v2540_v61, 8.507059e+37 }
0x143e   :  { %v2673_v8 = vpop.eup %2672 }
0x143f   :  { %v2532_v56 = vmul.f32 %v2673_v8, %v2530_v25  ;;  %vm2537_vm12 = vweird.f32 %v2673_v8 }
0x1440   :  { %vm2538_vm11 = vmor %vm2536_vm10, %vm2537_vm12 }
0x1441   :  { %v2533_v12 = vsub.f32 1.0, %v2532_v56 }
0x1443   :  { %v2534_v41 = vmul.f32 %v2673_v8, %v2533_v12 }
0x1445   :  { %v2535_v28 = vadd.f32 %v2673_v8, %v2534_v41 }
0x1447   :  { %v2539_v13 = vsel %vm2538_vm11, %v2673_v8, %v2535_v28 }
0x1448   :  { %v2544_v30 = vsel %vm2541_vm13, %v2543_v54, %v2539_v13 }
0x1449   :  { %2546 = vst [vmem:[%s3503_s6] sm:$0xff] %v2544_v30 }
0x144a   :  { %2551 = vsyncpa [#allocation4], 1 }

</bundles_post_ra>
